<compile_context>
chip_gen: v7x
topology: tpu7x:2x2x1
jax: 0.10.0
libtpu: 0.0.40
codegen_flags: <defaults>
</compile_context>

<pallas_src>
import math

import jax
import jax.numpy as jnp
from jax.experimental import pallas as pl
from jax.experimental.pallas import tpu as pltpu

# ----------------------- small, module-consistent config -----------------------
START_LAYER = 0
END_LAYER = 2
N_LAYERS = END_LAYER - START_LAYER
EMBED_DIM = 32
N_HEADS = 4
N_KV_HEADS = 2
HEAD_DIM = EMBED_DIM // N_HEADS            # 8
GROUP = N_HEADS // N_KV_HEADS              # GQA group size (2)
FFN_HIDDEN = 64
CACHE_SIZE = 16
SEQ = 8                                    # "batch_size" (== #tokens) in the torch code
CONTEXT = CACHE_SIZE + SEQ                 # 24
RMS_EPS = 1e-5
HAS_QKV_BIAS = True
USE_DRELU = False                          # False => SiLU(gate) * up (standard Llama)
N_KV_CACHES = N_LAYERS * N_KV_HEADS

Q_DIM = N_HEADS * HEAD_DIM                 # 32
K_DIM = N_KV_HEADS * HEAD_DIM              # 16
QK_DIM = Q_DIM + K_DIM                     # 48 (RoPE'd columns)
QKV_DIM = QK_DIM + K_DIM                   # 64 (fused qkv output width)
KV_OUT = 2 * K_DIM                         # 32 (new [K || V] slab width)
VEC_DIM = 2 * EMBED_DIM + QKV_DIM          # 128 (attn_norm | ffn_norm | b_qkv)


# ------------------------------- Pallas kernel ---------------------------------
def _llama_chunk_kernel(
    x_ref, bias_ref, cs_ref, rot_ref, kvc_ref, vec_ref,
    wqkv_ref, wo_ref, wgu_ref, wd_ref,
    xout_ref, kvnew_ref,
):
  f32 = jnp.float32
  layer = pl.program_id(0)

  # xout is the resident carried hidden state; seed it from the real input once.
  @pl.when(layer == 0)
  def _():
    xout_ref[...] = x_ref[...]

  x = xout_ref[...]                                        # (SEQ, E)

  vec = vec_ref[...]                                       # (1, 128)
  attn_norm = vec[:, :EMBED_DIM]                           # (1, 32)
  ffn_norm = vec[:, EMBED_DIM:2 * EMBED_DIM]               # (1, 32)
  b_qkv = vec[:, 2 * EMBED_DIM:]                           # (1, 64)

  # ---- attention RMSNorm ----
  h = x * jax.lax.rsqrt(jnp.mean(x * x, axis=-1, keepdims=True) + RMS_EPS) * attn_norm

  # ---- fused QKV projection: one (SEQ,E)x(E,64) MXU pass ----
  qkv = jnp.dot(h, wqkv_ref[...], preferred_element_type=f32) + b_qkv   # (SEQ, 64)

  # ---- RoPE on the packed [q0..q3 | k0 k1] block (block-diag rotate_half) ----
  cos = cs_ref[0]                                          # (SEQ, 48)
  sin = cs_ref[1]
  qk = qkv[:, :QK_DIM]                                     # (SEQ, 48)
  qk_rot = qk * cos + jnp.dot(qk, rot_ref[...], preferred_element_type=f32) * sin

  k_new = qk_rot[:, Q_DIM:]                                # (SEQ, 16) = [k0 | k1]
  v_new = qkv[:, QK_DIM:]                                  # (SEQ, 16) = [v0 | v1]

  # lane-dense new-KV slab for this layer: [k0 | k1 | v0 | v1]
  kvnew_ref[...] = jnp.concatenate([k_new, v_new], axis=-1)   # (SEQ, 32)

  kvc = kvc_ref[...]                                       # (KV, CACHE, 2*Dh): [Kcache | Vcache]
  bias_g = bias_ref[...]                                   # (GROUP*SEQ, CONTEXT)
  scale = 1.0 / math.sqrt(HEAD_DIM)

  # ---- attention, batched per kv head (GROUP query heads stacked on sublanes) ----
  ctx_blocks = []
  for g in range(N_KV_HEADS):
    q_g = jnp.concatenate(
        [qk_rot[:, (g * GROUP + r) * HEAD_DIM:(g * GROUP + r + 1) * HEAD_DIM]
         for r in range(GROUP)], axis=0)                   # (GROUP*SEQ, Dh)
    k_ctx = jnp.concatenate(
        [kvc[g, :, :HEAD_DIM], k_new[:, g * HEAD_DIM:(g + 1) * HEAD_DIM]],
        axis=0)                                            # (CONTEXT, Dh)
    v_ctx = jnp.concatenate(
        [kvc[g, :, HEAD_DIM:], v_new[:, g * HEAD_DIM:(g + 1) * HEAD_DIM]],
        axis=0)                                            # (CONTEXT, Dh)
    s = jax.lax.dot_general(q_g, k_ctx, (((1,), (1,)), ((), ())),
                            preferred_element_type=f32) * scale + bias_g   # (2*SEQ, CONTEXT)
    m = jnp.max(s, axis=-1, keepdims=True)
    e = jnp.exp(s - m)
    p = e * pl.reciprocal(jnp.sum(e, axis=-1, keepdims=True), approx=True)
    ctx_blocks.append(jnp.dot(p, v_ctx, preferred_element_type=f32))       # (2*SEQ, Dh)

  # reassemble lane-dense (SEQ, N_HEADS*Dh) context in query-head order
  ctx = jnp.concatenate(
      [ctx_blocks[g][r * SEQ:(r + 1) * SEQ, :]
       for g in range(N_KV_HEADS) for r in range(GROUP)], axis=-1)          # (SEQ, 32)

  # fused o_proj + residual
  x1 = x + jnp.dot(ctx, wo_ref[...], preferred_element_type=f32)

  # ---- FFN (fused gate/up matmul) ----
  h2 = x1 * jax.lax.rsqrt(jnp.mean(x1 * x1, axis=-1, keepdims=True) + RMS_EPS) * ffn_norm
  gu = jnp.dot(h2, wgu_ref[...], preferred_element_type=f32)                # (SEQ, 128)
  gate = gu[:, :FFN_HIDDEN]
  up = gu[:, FFN_HIDDEN:]
  if USE_DRELU:
    act = jnp.maximum(gate, 0.0) * jnp.maximum(up, 0.0)
  else:
    act = gate * jax.nn.sigmoid(gate) * up                                  # SiLU(gate) * up
  xout_ref[...] = x1 + jnp.dot(act, wd_ref[...], preferred_element_type=f32)


# ------------------------------ wrapper (glue) ----------------------------------
def _rotate_half_matrix():
  # rotate_half(t) == t @ R with R[j+half, j] = -1 (j < half), R[j-half, j] = 1
  half = HEAD_DIM // 2
  r = jnp.zeros((HEAD_DIM, HEAD_DIM), jnp.float32)
  idx = jnp.arange(half)
  r = r.at[idx + half, idx].set(-1.0)
  r = r.at[idx, idx + half].set(1.0)
  return r


def _pack_layer_params(params):
  """Stack per-layer weights on a leading layer axis with fused/lane-dense layouts."""
  wqkv, wo, wgu, wd, vec = [], [], [], [], []
  for p in params:
    wq = jnp.transpose(p["wq"], (1, 0, 2)).reshape(EMBED_DIM, Q_DIM)
    wk = jnp.transpose(p["wk"], (1, 0, 2)).reshape(EMBED_DIM, K_DIM)
    wv = jnp.transpose(p["wv"], (1, 0, 2)).reshape(EMBED_DIM, K_DIM)
    wqkv.append(jnp.concatenate([wq, wk, wv], axis=-1))                 # (E, 64)
    bq = jnp.transpose(p["bq"], (1, 0, 2)).reshape(1, Q_DIM)
    bk = jnp.transpose(p["bk"], (1, 0, 2)).reshape(1, K_DIM)
    bv = jnp.transpose(p["bv"], (1, 0, 2)).reshape(1, K_DIM)
    vec.append(jnp.concatenate([p["attn_norm"], p["ffn_norm"], bq, bk, bv], axis=-1))  # (1,128)
    wo.append(p["wo"].reshape(N_HEADS * HEAD_DIM, EMBED_DIM))           # (32, 32)
    wgu.append(jnp.concatenate([p["w_gate"], p["w_up"]], axis=-1))      # (32, 128)
    wd.append(p["w_down"])                                              # (64, 32)
  return (jnp.stack(wqkv), jnp.stack(wo), jnp.stack(wgu), jnp.stack(wd), jnp.stack(vec))


def llama_chunk_forward(x, attn_bias, rope_embed_cos, rope_embed_sin, *caches, params):
  """Mirror of LlamaModelChunk.forward.

  caches ordering matches KVCache.kv_caches:
    [key_t for (layer, kv_head)...,  value for (layer, kv_head)...]
  Returns (x, *new_keys, *new_values) with the same flat ordering as torch.
  """
  assert len(caches) == 2 * N_KV_CACHES

  # --- one-time glue outside the kernel ---
  key_t = jnp.stack(caches[:N_KV_CACHES]).reshape(N_LAYERS, N_KV_HEADS, HEAD_DIM, CACHE_SIZE)
  value = jnp.stack(caches[N_KV_CACHES:]).reshape(N_LAYERS, N_KV_HEADS, CACHE_SIZE, HEAD_DIM)
  kvc = jnp.concatenate([jnp.swapaxes(key_t, -1, -2), value], axis=-1)  # (L, KV, CACHE, 2*Dh)

  n_rope_heads = N_HEADS + N_KV_HEADS
  cs = jnp.stack([jnp.tile(rope_embed_cos, (1, n_rope_heads)),
                  jnp.tile(rope_embed_sin, (1, n_rope_heads))])         # (2, SEQ, 48)
  rot = jnp.kron(jnp.eye(n_rope_heads, dtype=jnp.float32), _rotate_half_matrix())  # (48, 48)
  bias_g = jnp.tile(attn_bias, (GROUP, 1))                              # (GROUP*SEQ, CONTEXT)

  wqkv, wo, wgu, wd, vec = _pack_layer_params(params)

  def lspec(shape):   # per-layer block, stacked on leading layer axis
    return pl.BlockSpec((None,) + shape, lambda l: (l,) + (0,) * len(shape))

  def cspec(shape):   # layer-invariant block
    return pl.BlockSpec(shape, lambda l: (0,) * len(shape))

  x_out, kv_new = pl.pallas_call(
      _llama_chunk_kernel,
      grid=(N_LAYERS,),
      in_specs=[
          cspec((SEQ, EMBED_DIM)),                        # x
          cspec((GROUP * SEQ, CONTEXT)),                  # attn bias, tiled over group
          cspec((2, SEQ, QK_DIM)),                        # packed cos/sin
          cspec((QK_DIM, QK_DIM)),                        # block-diag rotate_half matrix
          lspec((N_KV_HEADS, CACHE_SIZE, 2 * HEAD_DIM)),  # merged K/V cache
          lspec((1, VEC_DIM)),                            # norms + fused qkv bias
          lspec((EMBED_DIM, QKV_DIM)),                    # fused qkv weight
          lspec((N_HEADS * HEAD_DIM, EMBED_DIM)),         # fused o_proj weight
          lspec((EMBED_DIM, 2 * FFN_HIDDEN)),             # fused gate/up weight
          lspec((FFN_HIDDEN, EMBED_DIM)),                 # down weight
      ],
      out_specs=(
          cspec((SEQ, EMBED_DIM)),                        # resident x accumulator
          lspec((SEQ, KV_OUT)),                           # lane-dense new [K || V] per layer
      ),
      out_shape=(
          jax.ShapeDtypeStruct((SEQ, EMBED_DIM), jnp.float32),
          jax.ShapeDtypeStruct((N_LAYERS, SEQ, KV_OUT), jnp.float32),
      ),
      compiler_params=pltpu.CompilerParams(dimension_semantics=("arbitrary",)),
  )(x, bias_g, cs, rot, kvc, vec, wqkv, wo, wgu, wd)

  # split the stacked slab into the torch-compatible flat output tuple (end only)
  new_keys = [kv_new[i, :, j * HEAD_DIM:(j + 1) * HEAD_DIM]
              for i in range(N_LAYERS) for j in range(N_KV_HEADS)]
  new_values = [kv_new[i, :, K_DIM + j * HEAD_DIM:K_DIM + (j + 1) * HEAD_DIM]
                for i in range(N_LAYERS) for j in range(N_KV_HEADS)]
  return (x_out, *new_keys, *new_values)


# ----------------------------- reference (plain JAX) ----------------------------
def reference_forward(x, attn_bias, cos, sin, caches, params):
  def rmsnorm(v, w):
    return v * jax.lax.rsqrt(jnp.mean(v * v, axis=-1, keepdims=True) + RMS_EPS) * w

  def rope(t):
    half = HEAD_DIM // 2
    rot = jnp.concatenate([-t[:, half:], t[:, :half]], axis=-1)
    return t * cos + rot * sin

  key_t_caches = caches[:N_KV_CACHES]
  value_caches = caches[N_KV_CACHES:]
  new_keys, new_values = [], []
  for i in range(N_LAYERS):
    p = params[i]
    ktc = key_t_caches[i * N_KV_HEADS:(i + 1) * N_KV_HEADS]
    vc = value_caches[i * N_KV_HEADS:(i + 1) * N_KV_HEADS]
    h = rmsnorm(x, p["attn_norm"])
    k_rot, v_new = [], []
    for g in range(N_KV_HEADS):
      k_rot.append(rope(h @ p["wk"][g] + p["bk"][g]))
      v_new.append(h @ p["wv"][g] + p["bv"][g])
    attn_out = jnp.zeros_like(x)
    for qh in range(N_HEADS):
      g = qh // GROUP
      qv = rope(h @ p["wq"][qh] + p["bq"][qh])
      scores = jnp.concatenate([qv @ ktc[g], qv @ k_rot[g].T], axis=-1) / math.sqrt(HEAD_DIM)
      scores = scores + attn_bias
      pr = jax.nn.softmax(scores, axis=-1)
      ctx = pr[:, :CACHE_SIZE] @ vc[g] + pr[:, CACHE_SIZE:] @ v_new[g]
      attn_out = attn_out + ctx @ p["wo"][qh]
    x = x + attn_out
    h2 = rmsnorm(x, p["ffn_norm"])
    gate, up = h2 @ p["w_gate"], h2 @ p["w_up"]
    act = jnp.maximum(gate, 0.) * jnp.maximum(up, 0.) if USE_DRELU else jax.nn.silu(gate) * up
    x = x + act @ p["w_down"]
    new_keys.extend(k_rot)
    new_values.extend(v_new)
  return (x, *new_keys, *new_values)


# --------------------------------- setup ----------------------------------------
def init_params(key):
  params = []
  for i in range(N_LAYERS):
    ks = jax.random.split(jax.random.fold_in(key, i), 10)
    s = 0.05
    p = {
        "attn_norm": jnp.ones((1, EMBED_DIM), jnp.float32),
        "wq": jax.random.normal(ks[0], (N_HEADS, EMBED_DIM, HEAD_DIM), jnp.float32) * s,
        "bq": (jax.random.normal(ks[1], (N_HEADS, 1, HEAD_DIM), jnp.float32) * s
               if HAS_QKV_BIAS else jnp.zeros((N_HEADS, 1, HEAD_DIM), jnp.float32)),
        "wk": jax.random.normal(ks[2], (N_KV_HEADS, EMBED_DIM, HEAD_DIM), jnp.float32) * s,
        "bk": (jax.random.normal(ks[3], (N_KV_HEADS, 1, HEAD_DIM), jnp.float32) * s
               if HAS_QKV_BIAS else jnp.zeros((N_KV_HEADS, 1, HEAD_DIM), jnp.float32)),
        "wv": jax.random.normal(ks[4], (N_KV_HEADS, EMBED_DIM, HEAD_DIM), jnp.float32) * s,
        "bv": (jax.random.normal(ks[5], (N_KV_HEADS, 1, HEAD_DIM), jnp.float32) * s
               if HAS_QKV_BIAS else jnp.zeros((N_KV_HEADS, 1, HEAD_DIM), jnp.float32)),
        "wo": jax.random.normal(ks[6], (N_HEADS, HEAD_DIM, EMBED_DIM), jnp.float32) * s,
        "ffn_norm": jnp.ones((1, EMBED_DIM), jnp.float32),
        "w_gate": jax.random.normal(ks[7], (EMBED_DIM, FFN_HIDDEN), jnp.float32) * s,
        "w_up": jax.random.normal(ks[8], (EMBED_DIM, FFN_HIDDEN), jnp.float32) * s,
        "w_down": jax.random.normal(ks[9], (FFN_HIDDEN, EMBED_DIM), jnp.float32) * s,
    }
    params.append(p)
  return params


if __name__ == "__main__":
  key = jax.random.PRNGKey(0)
  k_x, k_cache_k, k_cache_v, k_p = jax.random.split(key, 4)

  x = jax.random.normal(k_x, (SEQ, EMBED_DIM), jnp.float32)

  # attn_bias: cache region visible, causal over the new-token block.
  causal = jnp.where(jnp.arange(SEQ)[None, :] <= jnp.arange(SEQ)[:, None], 0.0, -1e9)
  attn_bias = jnp.concatenate([jnp.zeros((SEQ, CACHE_SIZE), jnp.float32),
                               causal.astype(jnp.float32)], axis=-1)

  # RoPE tables for positions CACHE_SIZE .. CACHE_SIZE+SEQ-1 (Llama convention).
  half = HEAD_DIM // 2
  inv_freq = 1.0 / (10000.0 ** (jnp.arange(half, dtype=jnp.float32) / half))
  pos = (jnp.arange(SEQ, dtype=jnp.float32) + CACHE_SIZE)[:, None]
  ang = pos * inv_freq[None, :]
  rope_cos = jnp.concatenate([jnp.cos(ang), jnp.cos(ang)], axis=-1)
  rope_sin = jnp.concatenate([jnp.sin(ang), jnp.sin(ang)], axis=-1)

  # KV caches: (layer, kv_head) key_t caches first, then value caches.
  key_t_caches = tuple(
      jax.random.normal(jax.random.fold_in(k_cache_k, i), (HEAD_DIM, CACHE_SIZE), jnp.float32) * 0.1
      for i in range(N_KV_CACHES))
  value_caches = tuple(
      jax.random.normal(jax.random.fold_in(k_cache_v, i), (CACHE_SIZE, HEAD_DIM), jnp.float32) * 0.1
      for i in range(N_KV_CACHES))
  caches = key_t_caches + value_caches

  params = init_params(k_p)

  outs = llama_chunk_forward(x, attn_bias, rope_cos, rope_sin, *caches, params=params)
  outs = jax.block_until_ready(outs)

  refs = reference_forward(x, attn_bias, rope_cos, rope_sin, caches, params)
  max_err = max(float(jnp.max(jnp.abs(o - r))) for o, r in zip(outs, refs))
  assert max_err < 1e-2, f"mismatch vs reference: {max_err}"

  print("KERNEL_OK")
</pallas_src>

<mosaic_0001>
module attributes {stable_mosaic.version = 11 : i64} {
  func.func @_llama_chunk_kernel(%arg0: i32, %arg1: memref<8x32xf32, #tpu.memory_space<vmem>>, %arg2: memref<16x24xf32, #tpu.memory_space<vmem>>, %arg3: memref<2x8x48xf32, #tpu.memory_space<vmem>>, %arg4: memref<48x48xf32, #tpu.memory_space<vmem>>, %arg5: memref<1x2x16x16xf32, #tpu.memory_space<vmem>>, %arg6: memref<1x1x128xf32, #tpu.memory_space<vmem>>, %arg7: memref<1x32x64xf32, #tpu.memory_space<vmem>>, %arg8: memref<1x32x32xf32, #tpu.memory_space<vmem>>, %arg9: memref<1x32x128xf32, #tpu.memory_space<vmem>>, %arg10: memref<1x64x32xf32, #tpu.memory_space<vmem>>, %arg11: memref<8x32xf32, #tpu.memory_space<vmem>>, %arg12: memref<1x8x32xf32, #tpu.memory_space<vmem>>) attributes {dimension_semantics = [#tpu.dimension_semantics<arbitrary>], iteration_bounds = array<i64: 2>, scalar_prefetch = 0 : i64, scratch_operands = 0 : i64, tpu.core_type = #tpu.core_type<tc>, window_params = [{pipeline_mode = #tpu.pipeline_mode<synchronous>, transform_indices = @transform_0, window_bounds = array<i64: 8, 32>}, {pipeline_mode = #tpu.pipeline_mode<synchronous>, transform_indices = @transform_1, window_bounds = array<i64: 16, 24>}, {pipeline_mode = #tpu.pipeline_mode<synchronous>, transform_indices = @transform_2, window_bounds = array<i64: 2, 8, 48>}, {pipeline_mode = #tpu.pipeline_mode<synchronous>, transform_indices = @transform_3, window_bounds = array<i64: 48, 48>}, {transform_indices = @transform_4, window_bounds = array<i64: 1, 2, 16, 16>}, {transform_indices = @transform_5, window_bounds = array<i64: 1, 1, 128>}, {transform_indices = @transform_6, window_bounds = array<i64: 1, 32, 64>}, {transform_indices = @transform_7, window_bounds = array<i64: 1, 32, 32>}, {transform_indices = @transform_8, window_bounds = array<i64: 1, 32, 128>}, {transform_indices = @transform_9, window_bounds = array<i64: 1, 64, 32>}, {pipeline_mode = #tpu.pipeline_mode<synchronous>, transform_indices = @transform_10, window_bounds = array<i64: 8, 32>}, {transform_indices = @transform_11, window_bounds = array<i64: 1, 8, 32>}]} {
    %c0_i32 = arith.constant 0 : i32
    %0 = arith.cmpi eq, %arg0, %c0_i32 : i32
    %1 = arith.extui %0 : i1 to i32
    %c0_i32_0 = arith.constant 0 : i32
    %2 = arith.cmpi ne, %1, %c0_i32_0 : i32
    scf.if %2 {
      %c0_56 = arith.constant 0 : index
      %c0_57 = arith.constant 0 : index
      %135 = vector.load %arg1[%c0_56, %c0_57] : memref<8x32xf32, #tpu.memory_space<vmem>>, vector<8x32xf32>
      %c0_58 = arith.constant 0 : index
      %c0_59 = arith.constant 0 : index
      %136 = vector.load %arg11[%c0_58, %c0_59] : memref<8x32xf32, #tpu.memory_space<vmem>>, vector<8x32xf32>
      tpu.vector_store %arg11[%c0_58, %c0_59], %135 {strides = array<i32>} : memref<8x32xf32, #tpu.memory_space<vmem>>, vector<8x32xf32>,
    } else {
    }
    %c0 = arith.constant 0 : index
    %c0_1 = arith.constant 0 : index
    %3 = vector.load %arg11[%c0, %c0_1] : memref<8x32xf32, #tpu.memory_space<vmem>>, vector<8x32xf32>
    %c0_2 = arith.constant 0 : index
    %c0_3 = arith.constant 0 : index
    %c0_4 = arith.constant 0 : index
    %4 = vector.load %arg6[%c0_2, %c0_3, %c0_4] : memref<1x1x128xf32, #tpu.memory_space<vmem>>, vector<1x1x128xf32>
    %5 = vector.shape_cast %4 : vector<1x1x128xf32> to vector<1x128xf32>
    %6 = vector.extract_strided_slice %5 {offsets = [0, 0], sizes = [1, 32], strides = [1, 1]} : vector<1x128xf32> to vector<1x32xf32>
    %7 = vector.extract_strided_slice %5 {offsets = [0, 32], sizes = [1, 32], strides = [1, 1]} : vector<1x128xf32> to vector<1x32xf32>
    %8 = vector.extract_strided_slice %5 {offsets = [0, 64], sizes = [1, 64], strides = [1, 1]} : vector<1x128xf32> to vector<1x64xf32>
    %9 = arith.mulf %3, %3 : vector<8x32xf32>
    %cst = arith.constant dense<0.000000e+00> : vector<8xf32>
    %10 = vector.multi_reduction <add>, %9, %cst [1] : vector<8x32xf32> to vector<8xf32>
    %11 = vector.shape_cast %10 : vector<8xf32> to vector<8x1xf32>
    %cst_5 = arith.constant 3.200000e+01 : f32
    %12 = vector.broadcast %cst_5 : f32 to vector<8x1xf32>
    %13 = arith.divf %11, %12 : vector<8x1xf32>
    %cst_6 = arith.constant 9.99999974E-6 : f32
    %14 = vector.broadcast %cst_6 : f32 to vector<8x1xf32>
    %15 = arith.addf %13, %14 : vector<8x1xf32>
    %16 = math.rsqrt %15 : vector<8x1xf32>
    %17 = vector.broadcast %16 : vector<8x1xf32> to vector<8x32xf32>
    %18 = arith.mulf %3, %17 : vector<8x32xf32>
    %19 = vector.broadcast %6 : vector<1x32xf32> to vector<8x32xf32>
    %20 = arith.mulf %18, %19 : vector<8x32xf32>
    %c0_7 = arith.constant 0 : index
    %c0_8 = arith.constant 0 : index
    %c0_9 = arith.constant 0 : index
    %21 = vector.load %arg7[%c0_7, %c0_8, %c0_9] : memref<1x32x64xf32, #tpu.memory_space<vmem>>, vector<1x32x64xf32>
    %22 = vector.shape_cast %21 : vector<1x32x64xf32> to vector<32x64xf32>
    %cst_10 = arith.constant dense<0.000000e+00> : vector<8x64xf32>
    %23 = tpu.matmul %20, %22, %cst_10 {dimension_numbers = #tpu.dot_dimension_numbers<[1], [0], [0], [1], [0, 0, 1, 1], [], []>} : vector<8x32xf32>, vector<32x64xf32>, vector<8x64xf32> -> vector<8x64xf32>
    %24 = vector.broadcast %8 : vector<1x64xf32> to vector<8x64xf32>
    %25 = arith.addf %23, %24 : vector<8x64xf32>
    %c0_11 = arith.constant 0 : index
    %c0_12 = arith.constant 0 : index
    %c0_13 = arith.constant 0 : index
    %26 = vector.load %arg3[%c0_11, %c0_12, %c0_13] : memref<2x8x48xf32, #tpu.memory_space<vmem>>, vector<1x8x48xf32>
    %27 = vector.shape_cast %26 : vector<1x8x48xf32> to vector<8x48xf32>
    %c1 = arith.constant 1 : index
    %c0_14 = arith.constant 0 : index
    %c0_15 = arith.constant 0 : index
    %28 = vector.load %arg3[%c1, %c0_14, %c0_15] : memref<2x8x48xf32, #tpu.memory_space<vmem>>, vector<1x8x48xf32>
    %29 = vector.shape_cast %28 : vector<1x8x48xf32> to vector<8x48xf32>
    %30 = vector.extract_strided_slice %25 {offsets = [0, 0], sizes = [8, 48], strides = [1, 1]} : vector<8x64xf32> to vector<8x48xf32>
    %31 = arith.mulf %30, %27 : vector<8x48xf32>
    %c0_16 = arith.constant 0 : index
    %c0_17 = arith.constant 0 : index
    %32 = vector.load %arg4[%c0_16, %c0_17] : memref<48x48xf32, #tpu.memory_space<vmem>>, vector<48x48xf32>
    %cst_18 = arith.constant dense<0.000000e+00> : vector<8x48xf32>
    %33 = tpu.matmul %30, %32, %cst_18 {dimension_numbers = #tpu.dot_dimension_numbers<[1], [0], [0], [1], [0, 0, 1, 1], [], []>} : vector<8x48xf32>, vector<48x48xf32>, vector<8x48xf32> -> vector<8x48xf32>
    %34 = arith.mulf %33, %29 : vector<8x48xf32>
    %35 = arith.addf %31, %34 : vector<8x48xf32>
    %36 = vector.extract_strided_slice %35 {offsets = [0, 32], sizes = [8, 16], strides = [1, 1]} : vector<8x48xf32> to vector<8x16xf32>
    %37 = vector.extract_strided_slice %25 {offsets = [0, 48], sizes = [8, 16], strides = [1, 1]} : vector<8x64xf32> to vector<8x16xf32>
    %38 = tpu.concatenate %36, %37 in 1 : vector<8x16xf32>, vector<8x16xf32> -> vector<8x32xf32>
    %c0_19 = arith.constant 0 : index
    %c0_20 = arith.constant 0 : index
    %c0_21 = arith.constant 0 : index
    %39 = vector.load %arg12[%c0_19, %c0_20, %c0_21] : memref<1x8x32xf32, #tpu.memory_space<vmem>>, vector<1x8x32xf32>
    %40 = vector.shape_cast %39 : vector<1x8x32xf32> to vector<8x32xf32>
    %41 = vector.shape_cast %38 : vector<8x32xf32> to vector<1x8x32xf32>
    tpu.vector_store %arg12[%c0_19, %c0_20, %c0_21], %41 {strides = array<i32>} : memref<1x8x32xf32, #tpu.memory_space<vmem>>, vector<1x8x32xf32>,
    %c0_22 = arith.constant 0 : index
    %c0_23 = arith.constant 0 : index
    %c0_24 = arith.constant 0 : index
    %c0_25 = arith.constant 0 : index
    %42 = vector.load %arg5[%c0_22, %c0_23, %c0_24, %c0_25] : memref<1x2x16x16xf32, #tpu.memory_space<vmem>>, vector<1x2x16x16xf32>
    %43 = vector.shape_cast %42 : vector<1x2x16x16xf32> to vector<2x16x16xf32>
    %c0_26 = arith.constant 0 : index
    %c0_27 = arith.constant 0 : index
    %44 = vector.load %arg2[%c0_26, %c0_27] : memref<16x24xf32, #tpu.memory_space<vmem>>, vector<16x24xf32>
    %45 = vector.extract_strided_slice %35 {offsets = [0, 0], sizes = [8, 8], strides = [1, 1]} : vector<8x48xf32> to vector<8x8xf32>
    %46 = vector.extract_strided_slice %35 {offsets = [0, 8], sizes = [8, 8], strides = [1, 1]} : vector<8x48xf32> to vector<8x8xf32>
    %47 = tpu.concatenate %45, %46 in 0 : vector<8x8xf32>, vector<8x8xf32> -> vector<16x8xf32>
    %48 = vector.extract_strided_slice %43 {offsets = [0, 0, 0], sizes = [1, 16, 8], strides = [1, 1, 1]} : vector<2x16x16xf32> to vector<1x16x8xf32>
    %49 = vector.shape_cast %48 : vector<1x16x8xf32> to vector<16x8xf32>
    %50 = vector.extract_strided_slice %36 {offsets = [0, 0], sizes = [8, 8], strides = [1, 1]} : vector<8x16xf32> to vector<8x8xf32>
    %51 = tpu.concatenate %49, %50 in 0 : vector<16x8xf32>, vector<8x8xf32> -> vector<24x8xf32>
    %52 = vector.extract_strided_slice %43 {offsets = [0, 0, 8], sizes = [1, 16, 8], strides = [1, 1, 1]} : vector<2x16x16xf32> to vector<1x16x8xf32>
    %53 = vector.shape_cast %52 : vector<1x16x8xf32> to vector<16x8xf32>
    %54 = vector.extract_strided_slice %37 {offsets = [0, 0], sizes = [8, 8], strides = [1, 1]} : vector<8x16xf32> to vector<8x8xf32>
    %55 = tpu.concatenate %53, %54 in 0 : vector<16x8xf32>, vector<8x8xf32> -> vector<24x8xf32>
    %cst_28 = arith.constant dense<0.000000e+00> : vector<16x24xf32>
    %56 = tpu.matmul %47, %51, %cst_28 {dimension_numbers = #tpu.dot_dimension_numbers<[1], [1], [0], [0], [0, 0, 1, 0], [], []>} : vector<16x8xf32>, vector<24x8xf32>, vector<16x24xf32> -> vector<16x24xf32>
    %cst_29 = arith.constant 0.353553385 : f32
    %57 = vector.broadcast %cst_29 : f32 to vector<16x24xf32>
    %58 = arith.mulf %56, %57 : vector<16x24xf32>
    %59 = arith.addf %58, %44 : vector<16x24xf32>
    %cst_30 = arith.constant dense<0xFF800000> : vector<16xf32>
    %60 = vector.multi_reduction <maximumf>, %59, %cst_30 [1] : vector<16x24xf32> to vector<16xf32>
    %61 = vector.shape_cast %60 : vector<16xf32> to vector<16x1xf32>
    %62 = vector.broadcast %61 : vector<16x1xf32> to vector<16x24xf32>
    %63 = arith.subf %59, %62 : vector<16x24xf32>
    %64 = math.exp %63 : vector<16x24xf32>
    %cst_31 = arith.constant dense<0.000000e+00> : vector<16xf32>
    %65 = vector.multi_reduction <add>, %64, %cst_31 [1] : vector<16x24xf32> to vector<16xf32>
    %66 = vector.shape_cast %65 : vector<16xf32> to vector<16x1xf32>
    %67 = tpu.reciprocal %66 {approx = true} : vector<16x1xf32> -> vector<16x1xf32>
    %68 = vector.broadcast %67 : vector<16x1xf32> to vector<16x24xf32>
    %69 = arith.mulf %64, %68 : vector<16x24xf32>
    %cst_32 = arith.constant dense<0.000000e+00> : vector<16x8xf32>
    %70 = tpu.matmul %69, %55, %cst_32 {dimension_numbers = #tpu.dot_dimension_numbers<[1], [0], [0], [1], [0, 0, 1, 1], [], []>} : vector<16x24xf32>, vector<24x8xf32>, vector<16x8xf32> -> vector<16x8xf32>
    %71 = vector.extract_strided_slice %35 {offsets = [0, 16], sizes = [8, 8], strides = [1, 1]} : vector<8x48xf32> to vector<8x8xf32>
    %72 = vector.extract_strided_slice %35 {offsets = [0, 24], sizes = [8, 8], strides = [1, 1]} : vector<8x48xf32> to vector<8x8xf32>
    %73 = tpu.concatenate %71, %72 in 0 : vector<8x8xf32>, vector<8x8xf32> -> vector<16x8xf32>
    %74 = vector.extract_strided_slice %43 {offsets = [1, 0, 0], sizes = [1, 16, 8], strides = [1, 1, 1]} : vector<2x16x16xf32> to vector<1x16x8xf32>
    %75 = vector.shape_cast %74 : vector<1x16x8xf32> to vector<16x8xf32>
    %76 = vector.extract_strided_slice %36 {offsets = [0, 8], sizes = [8, 8], strides = [1, 1]} : vector<8x16xf32> to vector<8x8xf32>
    %77 = tpu.concatenate %75, %76 in 0 : vector<16x8xf32>, vector<8x8xf32> -> vector<24x8xf32>
    %78 = vector.extract_strided_slice %43 {offsets = [1, 0, 8], sizes = [1, 16, 8], strides = [1, 1, 1]} : vector<2x16x16xf32> to vector<1x16x8xf32>
    %79 = vector.shape_cast %78 : vector<1x16x8xf32> to vector<16x8xf32>
    %80 = vector.extract_strided_slice %37 {offsets = [0, 8], sizes = [8, 8], strides = [1, 1]} : vector<8x16xf32> to vector<8x8xf32>
    %81 = tpu.concatenate %79, %80 in 0 : vector<16x8xf32>, vector<8x8xf32> -> vector<24x8xf32>
    %cst_33 = arith.constant dense<0.000000e+00> : vector<16x24xf32>
    %82 = tpu.matmul %73, %77, %cst_33 {dimension_numbers = #tpu.dot_dimension_numbers<[1], [1], [0], [0], [0, 0, 1, 0], [], []>} : vector<16x8xf32>, vector<24x8xf32>, vector<16x24xf32> -> vector<16x24xf32>
    %cst_34 = arith.constant 0.353553385 : f32
    %83 = vector.broadcast %cst_34 : f32 to vector<16x24xf32>
    %84 = arith.mulf %82, %83 : vector<16x24xf32>
    %85 = arith.addf %84, %44 : vector<16x24xf32>
    %cst_35 = arith.constant dense<0xFF800000> : vector<16xf32>
    %86 = vector.multi_reduction <maximumf>, %85, %cst_35 [1] : vector<16x24xf32> to vector<16xf32>
    %87 = vector.shape_cast %86 : vector<16xf32> to vector<16x1xf32>
    %88 = vector.broadcast %87 : vector<16x1xf32> to vector<16x24xf32>
    %89 = arith.subf %85, %88 : vector<16x24xf32>
    %90 = math.exp %89 : vector<16x24xf32>
    %cst_36 = arith.constant dense<0.000000e+00> : vector<16xf32>
    %91 = vector.multi_reduction <add>, %90, %cst_36 [1] : vector<16x24xf32> to vector<16xf32>
    %92 = vector.shape_cast %91 : vector<16xf32> to vector<16x1xf32>
    %93 = tpu.reciprocal %92 {approx = true} : vector<16x1xf32> -> vector<16x1xf32>
    %94 = vector.broadcast %93 : vector<16x1xf32> to vector<16x24xf32>
    %95 = arith.mulf %90, %94 : vector<16x24xf32>
    %cst_37 = arith.constant dense<0.000000e+00> : vector<16x8xf32>
    %96 = tpu.matmul %95, %81, %cst_37 {dimension_numbers = #tpu.dot_dimension_numbers<[1], [0], [0], [1], [0, 0, 1, 1], [], []>} : vector<16x24xf32>, vector<24x8xf32>, vector<16x8xf32> -> vector<16x8xf32>
    %97 = vector.extract_strided_slice %70 {offsets = [0, 0], sizes = [8, 8], strides = [1, 1]} : vector<16x8xf32> to vector<8x8xf32>
    %98 = vector.extract_strided_slice %70 {offsets = [8, 0], sizes = [8, 8], strides = [1, 1]} : vector<16x8xf32> to vector<8x8xf32>
    %99 = vector.extract_strided_slice %96 {offsets = [0, 0], sizes = [8, 8], strides = [1, 1]} : vector<16x8xf32> to vector<8x8xf32>
    %100 = vector.extract_strided_slice %96 {offsets = [8, 0], sizes = [8, 8], strides = [1, 1]} : vector<16x8xf32> to vector<8x8xf32>
    %101 = tpu.concatenate %97, %98, %99, %100 in 1 : vector<8x8xf32>, vector<8x8xf32>, vector<8x8xf32>, vector<8x8xf32> -> vector<8x32xf32>
    %c0_38 = arith.constant 0 : index
    %c0_39 = arith.constant 0 : index
    %c0_40 = arith.constant 0 : index
    %102 = vector.load %arg8[%c0_38, %c0_39, %c0_40] : memref<1x32x32xf32, #tpu.memory_space<vmem>>, vector<1x32x32xf32>
    %103 = vector.shape_cast %102 : vector<1x32x32xf32> to vector<32x32xf32>
    %cst_41 = arith.constant dense<0.000000e+00> : vector<8x32xf32>
    %104 = tpu.matmul %101, %103, %cst_41 {dimension_numbers = #tpu.dot_dimension_numbers<[1], [0], [0], [1], [0, 0, 1, 1], [], []>} : vector<8x32xf32>, vector<32x32xf32>, vector<8x32xf32> -> vector<8x32xf32>
    %105 = arith.addf %3, %104 : vector<8x32xf32>
    %106 = arith.mulf %105, %105 : vector<8x32xf32>
    %cst_42 = arith.constant dense<0.000000e+00> : vector<8xf32>
    %107 = vector.multi_reduction <add>, %106, %cst_42 [1] : vector<8x32xf32> to vector<8xf32>
    %108 = vector.shape_cast %107 : vector<8xf32> to vector<8x1xf32>
    %cst_43 = arith.constant 3.200000e+01 : f32
    %109 = vector.broadcast %cst_43 : f32 to vector<8x1xf32>
    %110 = arith.divf %108, %109 : vector<8x1xf32>
    %cst_44 = arith.constant 9.99999974E-6 : f32
    %111 = vector.broadcast %cst_44 : f32 to vector<8x1xf32>
    %112 = arith.addf %110, %111 : vector<8x1xf32>
    %113 = math.rsqrt %112 : vector<8x1xf32>
    %114 = vector.broadcast %113 : vector<8x1xf32> to vector<8x32xf32>
    %115 = arith.mulf %105, %114 : vector<8x32xf32>
    %116 = vector.broadcast %7 : vector<1x32xf32> to vector<8x32xf32>
    %117 = arith.mulf %115, %116 : vector<8x32xf32>
    %c0_45 = arith.constant 0 : index
    %c0_46 = arith.constant 0 : index
    %c0_47 = arith.constant 0 : index
    %118 = vector.load %arg9[%c0_45, %c0_46, %c0_47] : memref<1x32x128xf32, #tpu.memory_space<vmem>>, vector<1x32x128xf32>
    %119 = vector.shape_cast %118 : vector<1x32x128xf32> to vector<32x128xf32>
    %cst_48 = arith.constant dense<0.000000e+00> : vector<8x128xf32>
    %120 = tpu.matmul %117, %119, %cst_48 {dimension_numbers = #tpu.dot_dimension_numbers<[1], [0], [0], [1], [0, 0, 1, 1], [], []>} : vector<8x32xf32>, vector<32x128xf32>, vector<8x128xf32> -> vector<8x128xf32>
    %121 = vector.extract_strided_slice %120 {offsets = [0, 0], sizes = [8, 64], strides = [1, 1]} : vector<8x128xf32> to vector<8x64xf32>
    %122 = vector.extract_strided_slice %120 {offsets = [0, 64], sizes = [8, 64], strides = [1, 1]} : vector<8x128xf32> to vector<8x64xf32>
    %123 = arith.negf %121 : vector<8x64xf32>
    %124 = math.exp %123 : vector<8x64xf32>
    %cst_49 = arith.constant 1.000000e+00 : f32
    %125 = vector.broadcast %cst_49 : f32 to vector<8x64xf32>
    %126 = arith.addf %125, %124 : vector<8x64xf32>
    %127 = arith.divf %125, %126 : vector<8x64xf32>
    %128 = arith.mulf %121, %127 : vector<8x64xf32>
    %129 = arith.mulf %128, %122 : vector<8x64xf32>
    %c0_50 = arith.constant 0 : index
    %c0_51 = arith.constant 0 : index
    %c0_52 = arith.constant 0 : index
    %130 = vector.load %arg10[%c0_50, %c0_51, %c0_52] : memref<1x64x32xf32, #tpu.memory_space<vmem>>, vector<1x64x32xf32>
    %131 = vector.shape_cast %130 : vector<1x64x32xf32> to vector<64x32xf32>
    %cst_53 = arith.constant dense<0.000000e+00> : vector<8x32xf32>
    %132 = tpu.matmul %129, %131, %cst_53 {dimension_numbers = #tpu.dot_dimension_numbers<[1], [0], [0], [1], [0, 0, 1, 1], [], []>} : vector<8x64xf32>, vector<64x32xf32>, vector<8x32xf32> -> vector<8x32xf32>
    %133 = arith.addf %105, %132 : vector<8x32xf32>
    %c0_54 = arith.constant 0 : index
    %c0_55 = arith.constant 0 : index
    %134 = vector.load %arg11[%c0_54, %c0_55] : memref<8x32xf32, #tpu.memory_space<vmem>>, vector<8x32xf32>
    tpu.vector_store %arg11[%c0_54, %c0_55], %133 {strides = array<i32>} : memref<8x32xf32, #tpu.memory_space<vmem>>, vector<8x32xf32>,
    return
  }
  func.func @transform_0(%arg0: i32) -> (i32, i32) {
    %c0_i32 = arith.constant 0 : i32
    %c0_i32_0 = arith.constant 0 : i32
    %c0_i32_1 = arith.constant 0 : i32
    return %c0_i32, %c0_i32_0 : i32, i32
  }
  func.func @transform_1(%arg0: i32) -> (i32, i32) {
    %c0_i32 = arith.constant 0 : i32
    %c0_i32_0 = arith.constant 0 : i32
    %c0_i32_1 = arith.constant 0 : i32
    return %c0_i32, %c0_i32_0 : i32, i32
  }
  func.func @transform_2(%arg0: i32) -> (i32, i32, i32) {
    %c0_i32 = arith.constant 0 : i32
    %c0_i32_0 = arith.constant 0 : i32
    %c0_i32_1 = arith.constant 0 : i32
    %c0_i32_2 = arith.constant 0 : i32
    return %c0_i32, %c0_i32_0, %c0_i32_1 : i32, i32, i32
  }
  func.func @transform_3(%arg0: i32) -> (i32, i32) {
    %c0_i32 = arith.constant 0 : i32
    %c0_i32_0 = arith.constant 0 : i32
    %c0_i32_1 = arith.constant 0 : i32
    return %c0_i32, %c0_i32_0 : i32, i32
  }
  func.func @transform_4(%arg0: i32) -> (i32, i32, i32, i32) {
    %c0_i32 = arith.constant 0 : i32
    %c0_i32_0 = arith.constant 0 : i32
    %c0_i32_1 = arith.constant 0 : i32
    %c0_i32_2 = arith.constant 0 : i32
    return %arg0, %c0_i32, %c0_i32_0, %c0_i32_1 : i32, i32, i32, i32
  }
  func.func @transform_5(%arg0: i32) -> (i32, i32, i32) {
    %c0_i32 = arith.constant 0 : i32
    %c0_i32_0 = arith.constant 0 : i32
    %c0_i32_1 = arith.constant 0 : i32
    return %arg0, %c0_i32, %c0_i32_0 : i32, i32, i32
  }
  func.func @transform_6(%arg0: i32) -> (i32, i32, i32) {
    %c0_i32 = arith.constant 0 : i32
    %c0_i32_0 = arith.constant 0 : i32
    %c0_i32_1 = arith.constant 0 : i32
    return %arg0, %c0_i32, %c0_i32_0 : i32, i32, i32
  }
  func.func @transform_7(%arg0: i32) -> (i32, i32, i32) {
    %c0_i32 = arith.constant 0 : i32
    %c0_i32_0 = arith.constant 0 : i32
    %c0_i32_1 = arith.constant 0 : i32
    return %arg0, %c0_i32, %c0_i32_0 : i32, i32, i32
  }
  func.func @transform_8(%arg0: i32) -> (i32, i32, i32) {
    %c0_i32 = arith.constant 0 : i32
    %c0_i32_0 = arith.constant 0 : i32
    %c0_i32_1 = arith.constant 0 : i32
    return %arg0, %c0_i32, %c0_i32_0 : i32, i32, i32
  }
  func.func @transform_9(%arg0: i32) -> (i32, i32, i32) {
    %c0_i32 = arith.constant 0 : i32
    %c0_i32_0 = arith.constant 0 : i32
    %c0_i32_1 = arith.constant 0 : i32
    return %arg0, %c0_i32, %c0_i32_0 : i32, i32, i32
  }
  func.func @transform_10(%arg0: i32) -> (i32, i32) {
    %c0_i32 = arith.constant 0 : i32
    %c0_i32_0 = arith.constant 0 : i32
    %c0_i32_1 = arith.constant 0 : i32
    return %c0_i32, %c0_i32_0 : i32, i32
  }
  func.func @transform_11(%arg0: i32) -> (i32, i32, i32) {
    %c0_i32 = arith.constant 0 : i32
    %c0_i32_0 = arith.constant 0 : i32
    %c0_i32_1 = arith.constant 0 : i32
    return %arg0, %c0_i32, %c0_i32_0 : i32, i32, i32
  }
}

</mosaic_0001>

<bundles_post_ra>
// kernel: tpu_custom_call.1
= control target key start
LH: loop header
LB: loop body
LE: loop exit
PB: predicated region body
PF: predicated region fallthrough
CT: control target
= control target key end

     0   :  { %s2889_s0 = inlined_call_operand.hbm [shape: f32[8,32], index: 0, kind: input, shape index: {}]   ;;  %s2890_s1 = inlined_call_operand.hbm [shape: f32[16,24], index: 1, kind: input, shape index: {}]   ;;  %s2891_s2 = inlined_call_operand.hbm [shape: f32[2,8,48], index: 2, kind: input, shape index: {}]   ;;  %s2892_s3 = inlined_call_operand.hbm [shape: f32[48,48], index: 3, kind: input, shape index: {}]   ;;  %s2893_s4 = inlined_call_operand.vmem [shape: f32[2,2,16,16], index: 4, kind: input, shape index: {}]   ;;  %s2894_s5 = inlined_call_operand.vmem [shape: f32[2,1,128], index: 5, kind: input, shape index: {}]   ;;  %s2895_s6 = inlined_call_operand.vmem [shape: f32[2,32,64], index: 6, kind: input, shape index: {}]   ;;  %s2896_s7 = inlined_call_operand.vmem [shape: f32[2,32,32], index: 7, kind: input, shape index: {}]   ;;  %s2897_s8 = inlined_call_operand.hbm [shape: f32[2,32,128], index: 8, kind: input, shape index: {}]   ;;  %s2898_s9 = inlined_call_operand.vmem [shape: f32[2,64,32], index: 9, kind: input, shape index: {}]   ;;  %s2899_s10 = inlined_call_operand.hbm [shape: f32[8,32], index: 10, kind: output, shape index: {0}]   ;;  %s2900_s11 = inlined_call_operand.hbm [shape: f32[2,8,32], index: 11, kind: output, shape index: {1}]  }
   0x1   :  { %2908 = sst [smem:[#allocation24_spill]] %s2889_s0 }
   0x2   :  { %2909 = sst [smem:[#allocation25_spill]] %s2890_s1 }
   0x3   :  { %2910 = sst [smem:[#allocation26_spill]] %s2891_s2 }
   0x4   :  { %2911 = sst [smem:[#allocation27_spill]] %s2892_s3 }
   0x5   :  { %2912 = sst [smem:[#allocation28_spill]] %s2897_s8 }
   0x6   :  { %2913 = sst [smem:[#allocation29_spill]] %s2899_s10 }
   0x7   :  { %17 = vsyncpa [#allocation3], 0 }
   0x8   :  { %18 = vsyncpa [#allocation6], 0 }
   0x9   :  { %19 = vsyncpa [#allocation9], 0 }
   0xa   :  { %20 = vsyncpa [#allocation4], 0 }
   0xb   :  { %21 = vsyncpa [#allocation13], 0 }
   0xc   :  { %23 = vsyncpa [#allocation13 + $0x1], 0  ;;  %s2407_s17 = smov 0   ;;  %s2409_s18 = smov 0  }
   0xd   :  { %s2411_s19 = smov 0   ;;  %s2413_s20 = smov 0  }
   0xe LB: > { %2914 = sst [smem:[#allocation20_spill]] %s2312_s17  ;;  %s2428_s21 = sadd.s32 4294967295, %s2324_s20   ;;  %s2324_s20 = sphi %s2413_s20, %s2955_s20   ;;  %s2320_s19 = sphi %s2411_s19, %s2952_s19   ;;  %s2316_s18 = sphi %s2409_s18, %s2954_s18   ;;  %s2312_s17 = sphi %s2407_s17, %s2953_s17  }
   0xf   : > { %2915 = sst [smem:[#allocation21_spill]] %s2320_s19  ;;  %s1661_s22 = sadd.s32 4294967294, %s2324_s20  }
  0x10   : > { %p237_p0 = scmp.ne.s32.totalorder %s2316_s18, %s2312_s17  ;;  %p2902_p1 = scmp.eq.s32.totalorder %s2428_s21, 0 }
  0x11   : > { %p314_p3 = scmp.eq.s32.totalorder %s1661_s22, 1  ;;  %p1662_p5 = scmp.ge.s32.totalorder %s2324_s20, 1 }
  0x12   : > { %p2437_p4 = por %p2902_p1, %p237_p0  ;;  %p321_p7 = scmp.lt.s32.totalorder %s2324_s20, 3 }
  0x13   : > { %p2442_p6 = por %p314_p3, %p237_p0  ;;  %s2326_s26 = smov [#allocation2]  }
  0x14   : > { %s2916_s23 = scalar_select %p2437_p4, 1, 0 }
  0x15   : > { %s2917_s24 = scalar_select %p2442_p6, 1, 0 }
  0x16   : > { %p2448_p9 = pnand %p1662_p5, %p321_p7  ;;  %s334_s27 = sshll.u32 %s2326_s26, 4  ;;  %s335_s27 = int_to_ptr.vmem [resolvable:$true] %s334_s27 }
  0x17   : > { %2918 = sst [smem:[#allocation22_spill]] %s2917_s24  ;;  %s2327_s28 = smov [#allocation5]  }
  0x18   : > { %s2919_s25 = scalar_select %p2448_p9, 1, 0 }
  0x19   : > { %p1956_p11 = pneg %p2448_p9  ;;  %s344_s29 = sshll.u32 %s2327_s28, 4  ;;  %s2461_s29 = int_to_ptr.vmem [resolvable:$true] %s344_s29 }
  0x1a   : > { %s2328_s12 = smov [#allocation7]   ;;  %s2921_s0 = sld [smem:[#allocation24_spill]] }
  0x1b   : > { %p2457_p12 = pnand %p1956_p11, %p2902_p1  ;;  %s2463_s13 = sshll.u32 %s2328_s12, 4  ;;  %s358_s13 = int_to_ptr.vmem [resolvable:$true] %s2463_s13 }
  0x1d   : > { %p2473_p0 = pneg %p2457_p12 }
  0x20   : > { %s2074_s16 = scalar_lea.hbm %s2921_s0, 128 }
  0x21   : > { %p2075_p13 = scmp.ne.s32.totalorder %s2921_s0, %s2074_s16  ;;  %p2081_p7 = scmp.lt.u32.totalorder %s2074_s16, %s2921_s0 }
  0x23   : > { %p2077_p3 = pnand %p2473_p0, %p2075_p13 }
  0x25   : > { %p2078_p5 = pneg %p2077_p3 }
  0x27   : > { %p2083_p11 = pnand %p2081_p7, %p2078_p5 }
  0x29   : > { %2086 = shalt.err (!%p2083_p11)
}
  0x2a   : > { %s2087_s14 = scalar_lea.vmem %s335_s27, 128  ;;  %p2095_p2 = scmp.lt.s32.totalorder %s335_s27, %s335_s27 }
  0x2b   : > { %p2088_p10 = scmp.ne.s32.totalorder %s335_s27, %s2087_s14  ;;  %p2096_p6 = scmp.lt.s32.totalorder %s2087_s14, %s2087_s14 }
  0x2d   : > { %p2090_p8 = pnand %p2088_p10, %p2473_p0  ;;  %p2097_p4 = por %p2096_p6, %p2095_p2 }
  0x2f   : > { %p2091_p1 = pneg %p2090_p8 }
  0x31   : > { %p2098_p9 = pnand %p2097_p4, %p2091_p1 }
  0x33   : > { %2101 = shalt.err (!%p2098_p9)
}
  0x34   : > { %1959 = dma.hbm_to_vmem [thread:$0]  (!%p2457_p12), %s2921_s0, 128, %s335_s27, [#allocation3]  }
  0x35   : > { %s2923_s1 = sld [smem:[#allocation25_spill]] }
  0x3b   : > { %s2102_s26 = scalar_lea.hbm %s2923_s1, 256 }
  0x3c   : > { %p2103_p8 = scmp.ne.s32.totalorder %s2923_s1, %s2102_s26  ;;  %p2109_p1 = scmp.lt.u32.totalorder %s2102_s26, %s2923_s1 }
  0x3e   : > { %p2105_p10 = pnand %p2103_p8, %p2473_p0 }
  0x40   : > { %p2106_p2 = pneg %p2105_p10 }
  0x42   : > { %p2111_p4 = pnand %p2109_p1, %p2106_p2 }
  0x44   : > { %2114 = shalt.err (!%p2111_p4)
}
  0x45   : > { %s2115_s27 = scalar_lea.vmem %s2461_s29, 256  ;;  %p2123_p3 = scmp.lt.s32.totalorder %s2461_s29, %s2461_s29 }
  0x46   : > { %p2116_p6 = scmp.ne.s32.totalorder %s2461_s29, %s2115_s27  ;;  %p2124_p5 = scmp.lt.s32.totalorder %s2115_s27, %s2115_s27 }
  0x48   : > { %p2118_p9 = pnand %p2116_p6, %p2473_p0  ;;  %p2125_p7 = por %p2124_p5, %p2123_p3 }
  0x4a   : > { %p2119_p13 = pneg %p2118_p9 }
  0x4c   : > { %p2126_p11 = pnand %p2125_p7, %p2119_p13 }
  0x4e   : > { %2129 = shalt.err (!%p2126_p11)
}
  0x4f   : > { %s2329_s17 = smov 128   ;;  %s2330_s10 = smov 8  }
  0x50   : > { %1962 = dma.hbm_to_vmem [thread:$0]  (!%p2457_p12), %s2923_s1, 256, %s2461_s29, [#allocation6], %s2329_s17, %s2329_s17, %s2330_s10  }
  0x51   : > { %s2924_s2 = sld [smem:[#allocation26_spill]] }
  0x57   : > { %s2130_s26 = scalar_lea.hbm %s2924_s2, 256 }
  0x58   : > { %p2131_p8 = scmp.ne.s32.totalorder %s2924_s2, %s2130_s26  ;;  %p2137_p1 = scmp.lt.u32.totalorder %s2130_s26, %s2924_s2 }
  0x5a   : > { %p2133_p10 = pnand %p2131_p8, %p2473_p0 }
  0x5c   : > { %p2134_p2 = pneg %p2133_p10 }
  0x5e   : > { %p2139_p4 = pnand %p2137_p1, %p2134_p2 }
  0x60   : > { %2142 = shalt.err (!%p2139_p4)
}
  0x61   : > { %s2143_s15 = scalar_lea.vmem %s358_s13, 256  ;;  %p2151_p3 = scmp.lt.s32.totalorder %s358_s13, %s358_s13 }
  0x62   : > { %p2144_p6 = scmp.ne.s32.totalorder %s358_s13, %s2143_s15  ;;  %p2152_p5 = scmp.lt.s32.totalorder %s2143_s15, %s2143_s15 }
  0x64   : > { %p2146_p9 = pnand %p2144_p6, %p2473_p0  ;;  %p2153_p7 = por %p2152_p5, %p2151_p3 }
  0x66   : > { %p2147_p13 = pneg %p2146_p9 }
  0x68   : > { %p2154_p11 = pnand %p2153_p7, %p2147_p13 }
  0x6a   : > { %2157 = shalt.err (!%p2154_p11)
}
  0x6b   : > { %1965 = dma.hbm_to_vmem [thread:$0]  (!%p2457_p12), %s2924_s2, 256, %s358_s13, [#allocation6], %s2329_s17, %s2329_s17, %s2330_s10  }
  0x6c   : > { %s2331_s22 = smov [#allocation8]   ;;  %s2925_s3 = sld [smem:[#allocation27_spill]] }
  0x6d   : > { %s370_s24 = sshll.u32 %s2331_s22, 4  ;;  %s371_s24 = int_to_ptr.vmem [resolvable:$true] %s370_s24 }
  0x72   : > { %s2158_s12 = scalar_lea.hbm %s2925_s3, 768 }
  0x73   : > { %p2159_p8 = scmp.ne.s32.totalorder %s2925_s3, %s2158_s12  ;;  %p2165_p1 = scmp.lt.u32.totalorder %s2158_s12, %s2925_s3 }
  0x75   : > { %p2161_p10 = pnand %p2159_p8, %p2473_p0 }
  0x77   : > { %p2162_p2 = pneg %p2161_p10 }
  0x79   : > { %p2167_p4 = pnand %p2165_p1, %p2162_p2 }
  0x7b   : > { %2170 = shalt.err (!%p2167_p4)
}
  0x7c   : > { %s2171_s13 = scalar_lea.vmem %s371_s24, 768  ;;  %p2179_p3 = scmp.lt.s32.totalorder %s371_s24, %s371_s24 }
  0x7d   : > { %p2172_p6 = scmp.ne.s32.totalorder %s371_s24, %s2171_s13  ;;  %p2180_p5 = scmp.lt.s32.totalorder %s2171_s13, %s2171_s13 }
  0x7f   : > { %p2174_p9 = pnand %p2172_p6, %p2473_p0  ;;  %p2181_p7 = por %p2180_p5, %p2179_p3 }
  0x81   : > { %p2175_p13 = pneg %p2174_p9 }
  0x83   : > { %p2182_p11 = pnand %p2181_p7, %p2175_p13 }
  0x85   : > { %2185 = shalt.err (!%p2182_p11)
}
  0x86   : > { %1968 = dma.hbm_to_vmem [thread:$0]  (!%p2457_p12), %s2925_s3, 768, %s371_s24, [#allocation9], %s2329_s17, %s2329_s17, %s2330_s10  }
  0x87   : > { %s2559_s30 = sadd.s32 1, %s2324_s20   ;;  %s224_s28 = sadd.s32 1, %s2320_s19 }
  0x88   : > { %s221_s29 = ssub.s32 %s2324_s20, %s2559_s30  ;;  %p231_p0 = scmp.ne.s32.totalorder %s2320_s19, %s2316_s18 }
  0x89   : > { %p222_p8 = scmp.eq.s32.totalorder %s221_s29, 0  ;;  %p232_p10 = scmp.eq.s32.totalorder %s2324_s20, 0 }
  0x8a   : > { %p2926_p2 = scmp.eq.s32.totalorder %s2428_s21, 1  ;;  %p1981_p4 = scmp.lt.s32.totalorder %s2324_s20, 2 }
  0x8b   : > { %s2575_s16 = scalar_select %p222_p8, %s2320_s19, %s224_s28  }
  0x8c   : > { %p2569_p1 = por %p2926_p2, %p231_p0  ;;  %p233_p6 = por %p232_p10, %p231_p0 }
  0x8d   : > { %2928 = sst [smem:[#allocation23_spill]] %s2575_s16  ;;  %s414_s26 = sand.u32 1, %s2324_s20  }
  0x8e   : > { %s416_s12 = sand.u32 1, %s2320_s19   ;;  %s1714_s14 = sshll.u32 %s2324_s20, 9 }
  0x8f   : > { %s1668_s24 = sshll.u32 %s416_s12, 5  ;;  %s2929_s8 = sld [smem:[#allocation28_spill]] }
  0x90   : > { %s418_s1 = scalar_lea.vmem [#allocation10], %s1668_s24  ;;  %p2585_p12 = pnand %p1981_p4, %p233_p6 }
  0x91   : > { %s425_s0 = sshll.u32 %s418_s1, 4  ;;  %s2591_s28 = scalar_lea.sflag [#allocation3], %s414_s26  ;;  %s2589_s0 = int_to_ptr.vmem [resolvable:$true] %s425_s0 }
  0x92   : > { %p2188_p13 = pneg %p2585_p12 }
  0x95   : > { %s2583_s13 = scalar_lea.hbm %s2929_s8, %s1714_s14  ;;  %s2191_s27 = scalar_lea.hbm %s2929_s8, 1024 }
  0x96   : > { %s2186_s12 = scalar_lea.hbm %s2583_s13, 512  ;;  %p2192_p7 = scmp.lt.u32.totalorder %s2583_s13, %s2929_s8 }
  0x97   : > { %p2187_p9 = scmp.ne.s32.totalorder %s2583_s13, %s2186_s12  ;;  %p2193_p11 = scmp.lt.u32.totalorder %s2191_s27, %s2186_s12 }
  0x98   : > { %p2195_p8 = scmp.lt.u32.totalorder %s2186_s12, %s2583_s13 }
  0x99   : > { %p2189_p3 = pnand %p2188_p13, %p2187_p9  ;;  %p2194_p0 = por %p2193_p11, %p2192_p7 }
  0x9b   : > { %p2190_p5 = pneg %p2189_p3  ;;  %p2196_p10 = por %p2195_p8, %p2194_p0 }
  0x9d   : > { %p2197_p2 = pnand %p2196_p10, %p2190_p5 }
  0x9f   : > { %2200 = shalt.err (!%p2197_p2)
}
  0xa0   : > { %s2201_s26 = scalar_lea.vmem %s2589_s0, 512  ;;  %s2332_s24 = smov [#allocation10]  }
  0xa1   : > { %p2202_p4 = scmp.ne.s32.totalorder %s2589_s0, %s2201_s26  ;;  %s2206_s14 = sshll.u32 %s2332_s24, 4  ;;  %s2207_s14 = int_to_ptr.vmem [resolvable:$false] %s2206_s14 }
  0xa2   : > { %s2208_s15 = scalar_lea.vmem %s2207_s14, 1024  ;;  %p2209_p3 = scmp.lt.s32.totalorder %s2589_s0, %s2207_s14 }
  0xa3   : > { %p2204_p6 = pnand %p2202_p4, %p2188_p13  ;;  %p2210_p7 = scmp.lt.s32.totalorder %s2208_s15, %s2201_s26 }
  0xa5   : > { %p2205_p9 = pneg %p2204_p6  ;;  %p2211_p11 = por %p2210_p7, %p2209_p3 }
  0xa7   : > { %p2212_p0 = pnand %p2211_p11, %p2205_p9 }
  0xa9   : > { %2215 = shalt.err (!%p2212_p0)
}
  0xaa   : > { %1972 = dma.hbm_to_vmem [thread:$0]  (!%p2585_p12), %s2583_s13, 512, %s2589_s0, %s2591_s28, %s2329_s17, %s2329_s17, %s2330_s10  }
  0xab   : > { %p2931_p13 = scmp.ne.s32.totalorder %s2919_s25, 0 }
  0xac   : > { %p2932_p5 = scmp.eq.s32.totalorder (!%p2931_p13), %s2428_s21, 0 }
  0xad   : > { %445 = sbr.rel (%p2931_p13) target bundleno = 3278 (0xcce), region = 60 }
  0xb4   : > { %2287 = dma.done.wait (%p2932_p5), [#allocation3], 128   ;;  %p2933_p8 = pmov %p2932_p5 }
  0xb5   : > { %p2934_p10 = pmov %p2932_p5 }
  0xb6   : > { %2289 = vsyncadd (%p2933_p8), [#allocation3], 4294967168 }
  0xb7   : > { %2291 = dma.done.wait (%p2934_p10), [#allocation6], 512   ;;  %p2935_p2 = pmov %p2932_p5 }
  0xb9   : > { %2293 = vsyncadd (%p2935_p2), [#allocation6], 4294966784  ;;  %p2936_p4 = pmov %p2935_p2 }
  0xba   : > { %p2937_p12 = pmov %p2935_p2 }
  0xbb   : > { %2295 = dma.done.wait (%p2936_p4), [#allocation9], 768  }
  0xbc   : > { %2297 = vsyncadd (%p2937_p12), [#allocation9], 4294966528  ;;  %s463_s25 = sand.u32 1, %s2428_s21   ;;  %s2638_s17 = sand.u32 1, %s2316_s18  }
  0xbd   : > { %s1676_s10 = sshll.u32 %s2638_s17, 5  ;;  %s464_s13 = scalar_lea.sflag [#allocation3], %s463_s25 }
  0xbe   : > { %s2641_s0 = scalar_lea.vmem [#allocation10], %s1676_s10  ;;  %p2938_p6 = scmp.ne.s32.totalorder %s2916_s23, 0 }
  0xc0   : > { %2299 = dma.done.wait (%p2938_p6), %s464_s13, 512  }
  0xc1   : > { %2301 = vsyncadd (%p2938_p6), %s464_s13, 4294966784  ;;  %s1677_s29 = sshll.u32 %s2638_s17, 3  ;;  %p529_p9 = scmp.lt.s32.totalorder %s2428_s21, 1 }
  0xc2   : > { %s2676_s1 = scalar_lea.vmem [#allocation12], %s1677_s29  ;;  %p2939_p3 = scmp.ne.s32.totalorder %s2428_s21, 0 }
  0xc3   : > { %s2650_s28 = scalar_select %p529_p9, %s2428_s21, 1 }
  0xc4   : > { %555 = sbr.rel (%p2939_p3) target bundleno = 203 (0xcb), region = 84  ;;  %v556_v0 = vld [vmem:[#allocation2] sm:$0xff] (!%p2939_p3)  ;;  %vm557_vm0 = vcmask (!%p2939_p3), 261120  }
  0xc5   : > { %s1715_s12 = sshll.u32 %s2650_s28, 5  ;;  %s536_s26 = scalar_lea.vmem %s2894_s5, %s2650_s28  ;;  %558 = vst.msk [vmem:[#allocation11] sm:$0xff] (!%p2939_p3), %vm557_vm0, %v556_v0 }
  0xc6   : > { %s2660_s23 = scalar_lea.vmem %s2893_s4, %s1715_s12  ;;  %s541_s10 = scalar_lea.vmem %s2895_s6, %s1715_s12 }
  0xc7   : > { %s2668_s3 = scalar_lea.vmem %s2896_s7, %s1715_s12  ;;  %s1718_s8 = sshll.u32 %s2650_s28, 6 }
  0xc8   : > { %s2674_s27 = scalar_lea.vmem %s2898_s9, %s1718_s8 }
  0xcb PF: > { %vm562_vm1 = vcmask 261120   ;;  %v578_v4 = vld [vmem:[%s541_s10] sm:$0xff]  ;;  %v579_v5 = vld [vmem:[%s541_s10 + $0x8] sm:$0xff]  ;;  %v580_v6 = vld [vmem:[%s541_s10 + $0x10] sm:$0xff]  ;;  %v2333_v7 = vmov 0.0|0.0   ;;  %vm2334_vm2 = vmmov 0  }
  0xcc   : > { %v2680_v1 = vld [vmem:[#allocation11] sm:$0xff]  ;;  %1873 = vmatprep.subr.bf16.mxu0 %v2333_v7  ;;  %v1874_v8 = vpack.c.bf16 %v579_v5, %v578_v4  ;;  %v2335_v10 = vmov 0.0   ;;  %1879 = vmatprep.subr.bf16.mxu1 %v2333_v7  ;;  %v2697_v12 = vld [vmem:[%s536_s26] ss:$0 sm:$0xff]  ;;  %v662_v13 = vld [vmem:[#allocation8] sm:$0xff]  ;;  %s2336_s19 = smov 64  }
  0xcd   : > { %v561_v2 = vmul.f32 %v2680_v1, %v2680_v1  ;;  %v581_v9 = vld [vmem:[%s541_s10 + $0x18] sm:$0xff]  ;;  %1778 = vmatprep.mubr.msk.f32.mxu0 %vm2334_vm2, %v2335_v10  ;;  %1793 = vmatprep.mubr.msk.f32.mxu1 %vm2334_vm2, %v2335_v10  ;;  %v663_v14 = vld [vmem:[#allocation8 + $0x8] sm:$0xff]  ;;  %v665_v17 = vld [vmem:[#allocation8 + $0x18] sm:$0xff]  ;;  %vm668_vm3 = vcmask 392192   ;;  %vm764_vm4 = vcmask 64512   ;;  %s2337_s16 = smov 96  }
  0xce   : > { %1875 = vmatpush3.bf16.msra.mxu0 %v1874_v8  ;;  %v1877_v11 = vpack.c.bf16 %v581_v9, %v580_v6  ;;  %v664_v15 = vld [vmem:[#allocation8 + $0x10] sm:$0xff]  ;;  %v1880_v16 = vpack.c.bf16 %v663_v14, %v662_v13  ;;  %v666_v25 = vld [vmem:[#allocation8 + $0x20] sm:$0xff]  ;;  %v667_v26 = vld [vmem:[#allocation8 + $0x28] sm:$0xff]  ;;  %s2338_s29 = smov 120   ;;  %vm856_vm6 = vcmask 195584   ;;  %s2339_s28 = smov 88  }
  0xcf   : > { %v563_v3 = vsel %vm562_vm1, %v561_v2, 0.0  ;;  %1876 = vmatprep.subr.bf16.mxu0 %v2333_v7  ;;  %v1883_v18 = vpack.c.bf16 %v665_v17, %v664_v15  ;;  %v1886_v27 = vpack.c.bf16 %v667_v26, %v666_v25  ;;  %v754_v32 = vld [vmem:[%s2660_s23] sm:$0xff]  ;;  %v755_v33 = vld [vmem:[%s2660_s23 + $0x8] sm:$0xff]  ;;  %vm2713_vm5 = vmpackc.low %vm764_vm4, %vm764_vm4  ;;  %s2340_s12 = smov 112   ;;  %s2341_s26 = smov 80   ;;  %vm751_vm7 = vcmask 130048  }
  0xd0   : > { %564 = vadd.xlane.f32.xlu0 %v563_v3  ;;  %1881 = vmatpush3.bf16.msra.mxu1 %v1880_v16  ;;  %v1888_v35 = vpack.c.bf16 %v755_v33, %v754_v32  ;;  %v658_v36 = vld [vmem:[#allocation7] sm:$0xff]  ;;  %v660_v37 = vld [vmem:[#allocation7 + $0x8] sm:$0xff]  ;;  %v2735_v46 = vld [vmem:[#allocation5 + $0x8] sm:$0xff]  ;;  %v2040_v55 = vpack.i.bf16 %v755_v33, %v754_v32  ;;  %s2342_s24 = smov 8   ;;  %s2343_s14 = smov 16   ;;  %vm1382_vm8 = vcmask 523264  }
  0xd1   : > { %1882 = vmatprep.subr.bf16.mxu1 %v2333_v7  ;;  %v2737_v49 = vld [vmem:[#allocation5] sm:$0xff]  ;;  %v756_v13 = vld [vmem:[%s2660_s23 + $0x10] sm:$0xff]  ;;  %v757_v14 = vld [vmem:[%s2660_s23 + $0x18] sm:$0xff]  ;;  %s2344_s23 = smov 24   ;;  %s1483_s10 = sshll.u32 %s2676_s1, 4  ;;  %s1484_s10 = int_to_ptr.vmem [resolvable:$true] %s1483_s10 }
  0xd2   : > { %1878 = vmatpush3.bf16.msra.mxu0 %v1877_v11  ;;  %v1898_v15 = vpack.c.bf16 %v757_v14, %v756_v13  ;;  %s1459_s13 = scalar_lea.sflag [#allocation13], %s2638_s17  ;;  %s2345_s2 = smov [#allocation12]  }
  0xd3   : > { %1890 = vmatprep.subr.msk.bf16.mxu0 %vm2713_vm5, %v1888_v35  ;;  %s2220_s8 = sshll.u32 %s2345_s2, 4  ;;  %s2221_s8 = int_to_ptr.vmem [resolvable:$false] %s2220_s8 }
  0xd4   : > { %1884 = vmatpush3.bf16.msra.mxu1 %v1883_v18  ;;  %p2223_p13 = scmp.lt.s32.totalorder %s1484_s10, %s2221_s8 }
  0xd5   : > { %1885 = vmatprep.subr.bf16.mxu1 %v2333_v7 }
  0xd8   : > { %1887 = vmatpush3.bf16.msra.mxu1 %v1886_v27 }
  0xe6   : > { %582 = vrot.lane.b32.xlu0 %v2697_v12, %s2336_s19 }
 0x15d   : > { %v565_v19 = vpop.xlane.xlu0 %564 }
 0x15e   : > { %v567_v20 = vmul.f32 0.03125, %v565_v19 }
 0x160   : > { %v568_v21 = vadd.f32 1e-05, %v567_v20 }
 0x161   : > { %v583_v28 = vpop.permute.xlu0 %582 }
 0x162   : > { %2050 = vrsqrt.f32 %v568_v21 }
 0x16c   : > { %v2051_v22 = vpop.eup %2050 }
 0x16d   : > { %v570_v23 = vmul.f32 %v2051_v22, %v2680_v1 }
 0x16f   : > { %v577_v24 = vmul.f32 %v2697_v12, %v570_v23 }
 0x171   : > { %1779 = vmatmul.mubr.msk.f32.vlgmr.msra.gmra.mrb[0].mxu0 %vm562_vm1, %v577_v24 }
 0x172   : > { %1893 = vmatpush3.bf16.xpose.msk.msra.mxu0 %vm2713_vm5, %v1888_v35 }
 0x244   : > { %v654_v29 = vpop.f32.mrb[0].mxu0 }
 0x245   : > { %v2706_v30 = vadd.f32 %v654_v29, %v583_v28  ;;  %v1780_v31 = vpop.f32.mrb[1].mxu0 }
 0x247   : > { %1794 = vmatmul.mubr.msk.f32.vlgmr.msra.gmra.mrb[0].mxu1 %vm668_vm3, %v2706_v30  ;;  %v661_v39 = vmul.f32 %v658_v36, %v2706_v30 }
 0x31a   : > { %v738_v38 = vpop.f32.mrb[0].mxu1 }
 0x31b   : > { %v742_v40 = vmul.f32 %v738_v38, %v660_v37  ;;  %v1795_v41 = vpop.f32.mrb[1].mxu1 }
 0x31d   : > { %v743_v42 = vadd.f32 %v742_v40, %v661_v39 }
 0x31f   : > { %745 = vrot.lane.b32.xlu1 %v743_v42, %s2337_s16  ;;  %1802 = vmatprep.mubr.msk.f32.mxu0 %vm764_vm4, %v743_v42 }
 0x323   : > { %760 = vrot.lane.b32.xlu1 %v743_v42, %s2338_s29 }
 0x391   : > { %v2725_v43 = vpop.permute.xlu1 %745 }
 0x392   : > { %1800 = vmatprep.subr.msk.mxu0 %vm764_vm4, %v2725_v43 }
 0x393   : > { %1801 = vmatpush3.xpose.msk.msra.mxu0 %vm764_vm4, %v2725_v43 }
 0x394   : > { %1908 = vmatprep.subr.bf16.mxu0 %v2333_v7 }
 0x395   : > { %v761_v44 = vpop.permute.xlu1 %760 }
 0x396   : > { %1803 = vmatmul.mubr.msk.f32.vlgmr.msra.gmra.mrb[2].mxu0 %vm764_vm4, %v761_v44 }
 0x397   : > { %1840 = vmatprep.mubr.msk.f32.mxu0 %vm2334_vm2, %v2335_v10 }
 0x469   : > { %v1804_v45 = vpop.f32.mrb[2].mxu0 }
 0x46a   : > { %v853_v47 = vmul.f32 0.35355338, %v1804_v45  ;;  %v843_v48 = vpop.f32.mrb[3].mxu0 }
 0x46b   : > { %v852_v50 = vmul.f32 0.35355338, %v843_v48 }
 0x46c   : > { %v855_v51 = vadd.f32 %v853_v47, %v2735_v46  ;;  %v2045_v47 = vpack.i.bf16 %v757_v14, %v756_v13 }
 0x46d   : > { %v854_v52 = vadd.f32 %v852_v50, %v2737_v49 }
 0x46e   : > { %v860_v53 = vsel %vm856_vm6, %v855_v51, -inf }
 0x46f   : > { %861 = vmax.xlane.f32.xlu0 %v860_v53  ;;  %v857_v54 = vsel %vm856_vm6, %v854_v52, -inf }
 0x470   : > { %858 = vmax.xlane.f32.xlu1 %v857_v54 }
 0x481   : > { %762 = vrot.lane.b32.xlu1 %v2706_v30, %s2339_s28 }
 0x485   : > { %2041 = vrot.lane.b32.xlu1 %v2040_v55, %s2338_s29 }
 0x489   : > { %969 = vrot.lane.b32.xlu1 %v743_v42, %s2339_s28 }
 0x48d   : > { %973 = vrot.lane.b32.xlu1 %v743_v42, %s2340_s12 }
 0x491   : > { %975 = vrot.lane.b32.xlu1 %v761_v44, %s2340_s12 }
 0x4fc   : > { %v862_v56 = vpop.xlane.xlu0 %861 }
 0x4fd   : > { %v864_v57 = vsub.f32 %v855_v51, %v862_v56  ;;  %v859_v58 = vpop.xlane.xlu1 %858 }
 0x4fe   : > { %v863_v59 = vsub.f32 %v854_v52, %v859_v58  ;;  %v1195_v58 = vld [vmem:[%s2668_s3] sm:$0xff] }
 0x4ff   : > { %v867_v60 = vmul.f32 1.442695, %v864_v57 }
 0x500   : > { %v865_v61 = vmul.f32 1.442695, %v863_v59  ;;  %v1196_v59 = vld [vmem:[%s2668_s3 + $0x8] sm:$0xff] }
 0x501   : > { %2052 = vpow2.f32 %v867_v60  ;;  %v763_v62 = vpop.permute.xlu1 %762  ;;  %v1909_v60 = vpack.c.bf16 %v1196_v59, %v1195_v58 }
 0x502   : > { %2054 = vpow2.f32 %v865_v61  ;;  %v1197_v61 = vld [vmem:[%s2668_s3 + $0x10] sm:$0xff] }
 0x503   : > { %1910 = vmatpush3.bf16.msra.mxu0 %v1909_v60 }
 0x504   : > { %1911 = vmatprep.subr.bf16.mxu0 %v2333_v7 }
 0x505   : > { %v2042_v63 = vpop.permute.xlu1 %2041 }
 0x506   : > { %v2044_v0 = vunpack.i.h.bf16 %v2042_v63  ;;  %v2043_v2 = vunpack.i.l.bf16 %v2042_v63 }
 0x508   : > { %v1894_v3 = vpack.c.bf16 %v2044_v0, %v2043_v2 }
 0x509   : > { %v970_v17 = vpop.permute.xlu1 %969 }
 0x50a   : > { %1895 = vmatprep.subr.bf16.mxu1 %v1894_v3 }
 0x50b   : > { %v2053_v4 = vpop.eup %2052  ;;  %1897 = vmatpush3.bf16.msra.mxu1 %v1894_v3 }
 0x50c   : > { %v872_v5 = vsel %vm856_vm6, %v2053_v4, 0.0  ;;  %v2055_v6 = vpop.eup %2054 }
 0x50d   : > { %873 = vadd.xlane.f32.xlu0 %v872_v5  ;;  %v869_v8 = vsel %vm856_vm6, %v2055_v6, 0.0  ;;  %v974_v22 = vpop.permute.xlu1 %973 }
 0x511   : > { %870 = vadd.xlane.f32.xlu0 %v869_v8  ;;  %v976_v23 = vpop.permute.xlu1 %975 }
 0x527   : > { %883 = vrot.lane.b32.xlu0 %v763_v62, %s2338_s29  ;;  %v1198_v62 = vld [vmem:[%s2668_s3 + $0x18] sm:$0xff]  ;;  %s1710_s3 = sshll.u32 %s2428_s21, 7 }
 0x528   : > { %v1912_v63 = vpack.c.bf16 %v1198_v62, %v1197_v61  ;;  %s2826_s25 = scalar_lea.hbm %s2900_s11, %s1710_s3 }
 0x52a   : > { %1913 = vmatpush3.bf16.msra.mxu0 %v1912_v63 }
 0x52b   : > { %1920 = vmatprep.subr.bf16.mxu0 %v2333_v7 }
 0x59a   : > { %v874_v9 = vpop.xlane.xlu0 %873 }
 0x59b   : > { %2056 = vrcp.f32 %v874_v9 }
 0x59e   : > { %v871_v11 = vpop.xlane.xlu0 %870 }
 0x59f   : > { %2058 = vrcp.f32 %v871_v11 }
 0x5a2   : > { %v884_v16 = vpop.permute.xlu0 %883 }
 0x5a3   : > { %1809 = vmatprep.subr.mxu1 %v884_v16 }
 0x5a4   : > { %1810 = vmatpush3.msra.mxu1 %v884_v16 }
 0x5a5   : > { %1900 = vmatprep.subr.msk.bf16.mxu1 %vm2713_vm5, %v1898_v15  ;;  %v2057_v18 = vpop.eup %2056 }
 0x5a6   : > { %v878_v21 = vmul.f32 %v2057_v18, %v2053_v4  ;;  %v1286_v18 = vld [vmem:[%s2641_s0 + $0x8] sm:$0xff] }
 0x5a9   : > { %v2059_v19 = vpop.eup %2058 }
 0x5aa   : > { %v877_v20 = vmul.f32 %v2059_v19, %v2055_v6 }
 0x5ac   : > { %1811 = vmatprep.mubr.msk.f32.mxu1 %vm856_vm6, %v877_v20  ;;  %v1288_v20 = vld [vmem:[%s2641_s0 + $0x18] sm:$0xff] }
 0x5ad   : > { %1812 = vmatmul.mubr.msk.f32.vlgmr.msra.gmra.mrb[2].mxu1 %vm856_vm6, %v878_v21 }
 0x5ae   : > { %1903 = vmatpush3.bf16.xpose.msk.msra.mxu1 %vm2713_vm5, %v1898_v15  ;;  %1820 = vmatprep.mubr.msk.f32.mxu1 %vm764_vm4, %v974_v22 }
 0x5af   : > { %1818 = vmatprep.subr.msk.mxu1 %vm764_vm4, %v970_v17 }
 0x5b6   : > { %1819 = vmatpush3.xpose.msk.msra.mxu1 %vm764_vm4, %v970_v17  ;;  %v1285_v17 = vld [vmem:[%s2641_s0] sm:$0xff] }
 0x5b7   : > { %v1915_v19 = vpack.c.bf16 %v1286_v18, %v1285_v17 }
 0x5b9   : > { %1821 = vmatmul.mubr.msk.f32.vlgmr.msra.gmra.mrb[4].mxu1 %vm764_vm4, %v976_v23 }
 0x680   : > { %v1813_v24 = vpop.f32.mrb[2].mxu1 }
 0x681   : > { %v2760_v25 = vpop.f32.mrb[3].mxu1 }
 0x68c   : > { %v1822_v26 = vpop.f32.mrb[4].mxu1 }
 0x68d   : > { %v1065_v27 = vmul.f32 0.35355338, %v1822_v26  ;;  %v1055_v28 = vpop.f32.mrb[5].mxu1 }
 0x68e   : > { %v1064_v29 = vmul.f32 0.35355338, %v1055_v28  ;;  %v1374_v28 = vld [vmem:[%s2674_s27] sm:$0xff] }
 0x68f   : > { %v1067_v31 = vadd.f32 %v1065_v27, %v2735_v46 }
 0x690   : > { %v1066_v32 = vadd.f32 %v1064_v29, %v2737_v49  ;;  %v1375_v29 = vld [vmem:[%s2674_s27 + $0x8] sm:$0xff] }
 0x691   : > { %v1071_v33 = vsel %vm856_vm6, %v1067_v31, -inf }
 0x692   : > { %1072 = vmax.xlane.f32.xlu0 %v1071_v33  ;;  %v1068_v34 = vsel %vm856_vm6, %v1066_v32, -inf  ;;  %v1377_v33 = vld [vmem:[%s2674_s27 + $0x18] sm:$0xff] }
 0x693   : > { %1069 = vmax.xlane.f32.xlu1 %v1068_v34 }
 0x6a4   : > { %971 = vrot.lane.b32.xlu1 %v2706_v30, %s2341_s26 }
 0x71f   : > { %v1073_v35 = vpop.xlane.xlu0 %1072 }
 0x720   : > { %v1075_v36 = vsub.f32 %v1067_v31, %v1073_v35  ;;  %v1070_v37 = vpop.xlane.xlu1 %1069  ;;  %v1376_v31 = vld [vmem:[%s2674_s27 + $0x10] sm:$0xff]  ;;  %v1378_v35 = vld [vmem:[%s2674_s27 + $0x20] sm:$0xff] }
 0x721   : > { %v1074_v38 = vsub.f32 %v1066_v32, %v1070_v37  ;;  %v1921_v32 = vpack.c.bf16 %v1375_v29, %v1374_v28  ;;  %v1924_v34 = vpack.c.bf16 %v1377_v33, %v1376_v31 }
 0x722   : > { %v1078_v39 = vmul.f32 1.442695, %v1075_v36  ;;  %v1379_v36 = vld [vmem:[%s2674_s27 + $0x28] sm:$0xff] }
 0x723   : > { %v1076_v40 = vmul.f32 1.442695, %v1074_v38  ;;  %v1927_v37 = vpack.c.bf16 %v1379_v36, %v1378_v35  ;;  %v1380_v38 = vld [vmem:[%s2674_s27 + $0x30] sm:$0xff] }
 0x724   : > { %2060 = vpow2.f32 %v1078_v39  ;;  %v972_v41 = vpop.permute.xlu1 %971  ;;  %v1381_v39 = vld [vmem:[%s2674_s27 + $0x38] sm:$0xff]  ;;  %s2216_s27 = scalar_lea.vmem %s1484_s10, 128 }
 0x725   : > { %1094 = vrot.lane.b32.xlu1 %v972_v41, %s2338_s29  ;;  %2062 = vpow2.f32 %v1076_v40  ;;  %v1930_v40 = vpack.c.bf16 %v1381_v39, %v1380_v38  ;;  %p2217_p7 = scmp.ne.s32.totalorder %s1484_s10, %s2216_s27 }
 0x727   : > { %p2218_p11 = pnand %p2217_p7, %p2569_p1 }
 0x729   : > { %1181 = vrot.lane.b32.xlu1 %v1813_v24, %s2342_s24  ;;  %p2219_p0 = pneg %p2218_p11 }
 0x72e   : > { %v2061_v42 = vpop.eup %2060 }
 0x72f   : > { %v1083_v44 = vsel %vm856_vm6, %v2061_v42, 0.0  ;;  %v2063_v45 = vpop.eup %2062 }
 0x730   : > { %1084 = vadd.xlane.f32.xlu0 %v1083_v44  ;;  %v1080_v46 = vsel %vm856_vm6, %v2063_v45, 0.0 }
 0x734   : > { %1081 = vadd.xlane.f32.xlu0 %v1080_v46 }
 0x74a   : > { %2046 = vrot.lane.b32.xlu0 %v2045_v47, %s2338_s29 }
 0x74e   : > { %1281 = vrot.lane.b32.xlu0 %v2697_v12, %s2337_s16 }
 0x797   : > { %v1095_v55 = vpop.permute.xlu1 %1094 }
 0x79b   : > { %v1182_v3 = vpop.permute.xlu1 %1181 }
 0x79c   : > { %v1192_v5 = vsel %vm764_vm4, %v2760_v25, %v1182_v3 }
 0x7bd   : > { %v1085_v48 = vpop.xlane.xlu0 %1084 }
 0x7be   : > { %2064 = vrcp.f32 %v1085_v48 }
 0x7c1   : > { %v1082_v49 = vpop.xlane.xlu0 %1081 }
 0x7c2   : > { %2066 = vrcp.f32 %v1082_v49 }
 0x7c5   : > { %v2047_v50 = vpop.permute.xlu0 %2046 }
 0x7c6   : > { %v2049_v51 = vunpack.i.h.bf16 %v2047_v50  ;;  %v2048_v52 = vunpack.i.l.bf16 %v2047_v50 }
 0x7c8   : > { %v1904_v53 = vpack.c.bf16 %v2049_v51, %v2048_v52  ;;  %v2065_v54 = vpop.eup %2064 }
 0x7c9   : > { %v1089_v12 = vmul.f32 %v2065_v54, %v2061_v42  ;;  %v1282_v25 = vpop.permute.xlu0 %1281 }
 0x7ca   : > { %1905 = vmatprep.subr.bf16.mxu1 %v1904_v53 }
 0x7cb   : > { %1907 = vmatpush3.bf16.msra.mxu1 %v1904_v53 }
 0x7cc   : > { %v2067_v56 = vpop.eup %2066  ;;  %1827 = vmatprep.subr.mxu1 %v1095_v55 }
 0x7cd   : > { %v1088_v57 = vmul.f32 %v2067_v56, %v2063_v45 }
 0x7cf   : > { %1828 = vmatpush3.msra.mxu1 %v1095_v55  ;;  %1829 = vmatprep.mubr.msk.f32.mxu1 %vm856_vm6, %v1088_v57 }
 0x7d0   : > { %1830 = vmatmul.mubr.msk.f32.vlgmr.msra.gmra.mrb[6].mxu1 %vm856_vm6, %v1089_v12  ;;  %1914 = vmatprep.subr.bf16.mxu1 %v2333_v7 }
 0x7d1   : > { %1851 = vmatprep.mubr.msk.f32.mxu1 %vm2334_vm2, %v2335_v10  ;;  %1916 = vmatpush3.bf16.msra.mxu1 %v1915_v19 }
 0x7d2   : > { %1917 = vmatprep.subr.bf16.mxu1 %v2333_v7 }
 0x8a3   : > { %v1831_v0 = vpop.f32.mrb[6].mxu1 }
 0x8a4   : > { %v1171_v2 = vpop.f32.mrb[7].mxu1 }
 0x8a5   : > { %1185 = vrot.lane.b32.xlu1 %v1171_v2, %s2343_s14 }
 0x8a9   : > { %1189 = vrot.lane.b32.xlu1 %v1831_v0, %s2344_s23 }
 0x917   : > { %v1186_v4 = vpop.permute.xlu1 %1185 }
 0x918   : > { %v1193_v6 = vsel %vm751_vm7, %v1192_v5, %v1186_v4 }
 0x91b   : > { %v1190_v8 = vpop.permute.xlu1 %1189 }
 0x91c   : > { %v1194_v9 = vsel %vm856_vm6, %v1193_v6, %v1190_v8 }
 0x91d   : > { %1841 = vmatmul.mubr.msk.f32.vlgmr.msra.gmra.mrb[4].mxu0 %vm562_vm1, %v1194_v9 }
 0x91e   : > { %1870 = vmatprep.mubr.msk.f32.mxu0 %vm2334_vm2, %v2335_v10  ;;  %v1287_v10 = vld [vmem:[%s2641_s0 + $0x10] sm:$0xff]  ;;  %1922 = vmatpush3.bf16.msra.mxu0 %v1921_v32 }
 0x91f   : > { %1923 = vmatprep.subr.bf16.mxu0 %v2333_v7 }
 0x922   : > { %1925 = vmatpush3.bf16.msra.mxu0 %v1924_v34 }
 0x923   : > { %1926 = vmatprep.subr.bf16.mxu0 %v2333_v7 }
 0x926   : > { %1928 = vmatpush3.bf16.msra.mxu0 %v1927_v37 }
 0x927   : > { %1929 = vmatprep.subr.bf16.mxu0 %v2333_v7 }
 0x92a   : > { %1931 = vmatpush3.bf16.msra.mxu0 %v1930_v40 }
 0x9f0   : > { %v1268_v11 = vpop.f32.mrb[4].mxu0 }
 0x9f1   : > { %v2792_v13 = vadd.f32 %v1268_v11, %v2680_v1  ;;  %v1842_v14 = vpop.f32.mrb[5].mxu0  ;;  %v1918_v1 = vpack.c.bf16 %v1288_v20, %v1287_v10 }
 0x9f3   : > { %v1273_v15 = vmul.f32 %v2792_v13, %v2792_v13  ;;  %1919 = vmatpush3.bf16.msra.mxu1 %v1918_v1 }
 0x9f5   : > { %v1274_v16 = vsel %vm562_vm1, %v1273_v15, 0.0 }
 0x9f6   : > { %1275 = vadd.xlane.f32.xlu1 %v1274_v16 }
 0xa83   : > { %v1276_v21 = vpop.xlane.xlu1 %1275 }
 0xa84   : > { %v1277_v22 = vmul.f32 0.03125, %v1276_v21 }
 0xa86   : > { %v1278_v23 = vadd.f32 1e-05, %v1277_v22 }
 0xa88   : > { %2068 = vrsqrt.f32 %v1278_v23 }
 0xa92   : > { %v2069_v24 = vpop.eup %2068 }
 0xa93   : > { %v1280_v26 = vmul.f32 %v2069_v24, %v2792_v13 }
 0xa95   : > { %v1284_v27 = vmul.f32 %v1282_v25, %v1280_v26 }
 0xa97   : > { %1852 = vmatmul.mubr.msk.f32.vlgmr.msra.gmra.mrb[8].mxu1 %vm562_vm1, %v1284_v27 }
 0xb6a   : > { %v1358_v41 = vpop.f32.mrb[8].mxu1 }
 0xb6b   : > { %1370 = vrot.lane.b32.xlu0 %v1358_v41, %s2336_s19  ;;  %v1853_v42 = vpop.f32.mrb[9].mxu1  ;;  %v1706_v44 = vmul.f32 -1.442695, %v1358_v41  ;;  %s2222_s19 = scalar_lea.vmem %s2221_s8, 256 }
 0xb6c   : > { %p2224_p5 = scmp.lt.s32.totalorder %s2222_s19, %s2216_s27 }
 0xb6d   : > { %2070 = vpow2.f32 %v1706_v44 }
 0xb6e   : > { %p2225_p8 = por %p2224_p5, %p2223_p13 }
 0xb6f   : > { %748 = vrot.lane.b32.xlu0 %v2706_v30, %s2337_s16 }
 0xb70   : > { %p2226_p10 = pnand %p2225_p8, %p2219_p0 }
 0xb77   : > { %v2071_v45 = vpop.eup %2070 }
 0xb78   : > { %v1365_v46 = vadd.f32 1.0, %v2071_v45 }
 0xb7a   : > { %2072 = vrcp.f32 %v1365_v46 }
 0xb84   : > { %v2073_v47 = vpop.eup %2072 }
 0xb85   : > { %v1368_v7 = vmul.f32 %v2073_v47, %v1358_v41 }
 0xbdd   : > { %v1371_v48 = vpop.permute.xlu0 %1370 }
 0xbde   : > { %v1373_v49 = vmul.f32 %v1371_v48, %v1368_v7 }
 0xbe0   : > { %1871 = vmatmul.mubr.msk.f32.vlgmr.msra.gmra.mrb[6].mxu0 %vm1382_vm8, %v1373_v49 }
 0xbe1   : > { %v749_v50 = vpop.permute.xlu0 %748 }
 0xbe2   : > { %v752_v51 = vsel %vm751_vm7, %v2725_v43, %v749_v50 }
 0xbe3   : > { %753 = vst.msk [vmem:[%s2676_s1] sm:$0xff] %vm562_vm1, %v752_v51 }
 0xbe4   : > { %2229 = shalt.err (!%p2226_p10)
}
 0xbe5   : > { %s2230_s17 = scalar_lea.hbm %s2826_s25, 128  ;;  %s2234_s29 = scalar_lea.hbm %s2900_s11, 256 }
 0xbe6   : > { %p2231_p2 = scmp.ne.s32.totalorder %s2826_s25, %s2230_s17  ;;  %p2235_p6 = scmp.lt.u32.totalorder %s2826_s25, %s2900_s11 }
 0xbe7   : > { %p2236_p9 = scmp.lt.u32.totalorder %s2234_s29, %s2230_s17  ;;  %p2238_p7 = scmp.lt.u32.totalorder %s2230_s17, %s2826_s25 }
 0xbe8   : > { %p2232_p4 = pnand %p2231_p2, %p2569_p1 }
 0xbe9   : > { %p2237_p3 = por %p2236_p9, %p2235_p6 }
 0xbea   : > { %p2233_p12 = pneg %p2232_p4 }
 0xbeb   : > { %p2239_p11 = por %p2238_p7, %p2237_p3 }
 0xbed   : > { %p2240_p0 = pnand %p2239_p11, %p2233_p12 }
 0xbef   : > { %2243 = shalt.err (!%p2240_p0)
}
 0xbf0   : > { %1952 = dma.vmem_to_hbm [thread:$0]  (%p2569_p1), %s1484_s10, 128, %s2826_s25, %s1459_s13  }
 0xbf1   : > { %s2346_s26 = smov [#allocation11]   ;;  %p2942_p5 = scmp.eq.s32.totalorder %s2428_s21, 1 }
 0xbf2   : > { %s1470_s24 = sshll.u32 %s2346_s26, 4  ;;  %s1471_s24 = int_to_ptr.vmem [resolvable:$true] %s1470_s24 }
 0xbf3   : > { %s2244_s14 = scalar_lea.vmem %s1471_s24, 128  ;;  %p2251_p2 = scmp.lt.s32.totalorder %s1471_s24, %s1471_s24 }
 0xbf4   : > { %p2245_p13 = scmp.ne.s32.totalorder %s1471_s24, %s2244_s14  ;;  %p2252_p4 = scmp.lt.s32.totalorder %s2244_s14, %s2244_s14 }
 0xbf6   : > { %p2246_p8 = pnand %p2245_p13, %p2942_p5  ;;  %p2253_p12 = por %p2252_p4, %p2251_p2 }
 0xbf8   : > { %p2247_p10 = pneg %p2246_p8 }
 0xbfa   : > { %p2254_p6 = pnand %p2253_p12, %p2247_p10 }
 0xcb3   : > { %v1452_v30 = vpop.f32.mrb[6].mxu0 }
 0xcb4   : > { %v1456_v43 = vadd.f32 %v1452_v30, %v2792_v13  ;;  %v1872_v52 = vpop.f32.mrb[7].mxu0 }
 0xcb6   : > { %1457 = vst.msk [vmem:[#allocation11] sm:$0xff] %vm562_vm1, %v1456_v43 }
 0xcb7   : > { %2257 = shalt.err (!%p2254_p6)
}
 0xcb8   : > { %s2943_s3 = sld [smem:[#allocation29_spill]]  ;;  %p2944_p9 = pmov %p2942_p5 }
 0xcbe   : > { %s2258_s0 = scalar_lea.hbm %s2943_s3, 128 }
 0xcbf   : > { %p2259_p1 = scmp.ne.s32.totalorder %s2943_s3, %s2258_s0  ;;  %p2264_p11 = scmp.lt.u32.totalorder %s2258_s0, %s2943_s3 }
 0xcc1   : > { %p2260_p3 = pnand %p2259_p1, %p2944_p9 }
 0xcc3   : > { %p2261_p7 = pneg %p2260_p3 }
 0xcc5   : > { %p2266_p0 = pnand %p2264_p11, %p2261_p7 }
 0xcc7   : > { %2269 = shalt.err (!%p2266_p0)
}
 0xcc8   : > { %p2945_p13 = pmov %p2942_p5 }
 0xcca   : > { %1951 = dma.vmem_to_hbm [thread:$0]  (%p2945_p13), %s1471_s24, 128, %s2943_s3, [#allocation4]  }
 0xccb   : > { %2303 = dma.done.wait (%p2942_p5), [#allocation4], 128   ;;  %p2946_p8 = pmov %p2942_p5 }
 0xccd   : > { %2305 = vsyncadd (%p2946_p8), [#allocation4], 4294967168 }
 0xcce PF: > { %s2947_s8 = sld [smem:[#allocation20_spill]]  ;;  %s2948_s19 = sld [smem:[#allocation22_spill]] }
 0xccf   : > { %p2950_p2 = scmp.ge.s32.totalorder %s2324_s20, 2 }
 0xcd4   : > { %s1499_s17 = sand.u32 1, %s2947_s8   ;;  %p2949_p10 = scmp.ne.s32.totalorder %s2948_s19, 0 }
 0xcd5   : > { %s1500_s1 = scalar_lea.sflag [#allocation13], %s1499_s17 }
 0xcd6   : > { %p1974_p4 = pnand %p2950_p2, %p2949_p10 }
 0xcd8   : > { %2307 = dma.done.wait (!%p1974_p4), %s1500_s1, 128  }
 0xcd9   : > { %2309 = vsyncadd (!%p1974_p4), %s1500_s1, 4294967168  ;;  %s2951_s16 = sld [smem:[#allocation21_spill]]  ;;  %s2952_s19 = sld [smem:[#allocation23_spill]] }
 0xcda   : > { %p26_p12 = scmp.ge.s32.totalorder %s2559_s30, 4   ;;  %s2953_s17 = smov %s2316_s18 }
 0xcdb   : > { %s2955_s20 = smov %s2559_s30 }
 0xcdc   :  { %28 = sbr.rel (!%p26_p12) target bundleno = 14 (0xe), region = 149 }
 0xcdf   : > { %s2954_s18 = smov %s2951_s16 }
 0xce3   :  { %1505 = vsyncpa [#allocation3], 1 }
 0xce4   :  { %1507 = vsyncpa [#allocation3 + $0x1], 1 }
 0xce5   :  { %1508 = vsyncpa [#allocation6], 1 }
 0xce6   :  { %1509 = vsyncpa [#allocation9], 1 }
 0xce7   :  { %1510 = vsyncpa [#allocation4], 1 }
 0xce8   :  { %1512 = vsyncpa [#allocation4 + $0x1], 1 }
 0xce9   :  { %1513 = vsyncpa [#allocation13], 1 }
 0xcea   :  { %1515 = vsyncpa [#allocation13 + $0x1], 1 }

</bundles_post_ra>
